<compile_context>
chip_gen: v6e
topology: v6e:2x2x1
jax: 0.10.0
libtpu: 0.0.40
codegen_flags: <defaults>
</compile_context>

<pallas_src>
from math import ceil

import jax
import jax.numpy as jnp
from jax.experimental import pallas as pl
from jax.experimental.pallas import tpu as pltpu

_LANE = 128


def _round_up(v, m):
    return ((v + m - 1) // m) * m


# ----------------------------------------------------------------------------
# In-kernel helpers (operate on a block of G graphs)
# ----------------------------------------------------------------------------
def _eye(n):
    r = jax.lax.broadcasted_iota(jnp.int32, (n, n), 0)
    c = jax.lax.broadcasted_iota(jnp.int32, (n, n), 1)
    return (r == c).astype(jnp.float32)


def _bmm(a, b):
    # (g, i, j) @ (g, j, k) -> (g, i, k)
    return jnp.einsum("gij,gjk->gik", a, b, preferred_element_type=jnp.float32)


def _bmm_tn(a, b):
    # contract the node axis of both operands: (g, n, i), (g, n, j) -> (g, i, j)
    return jnp.einsum("gni,gnj->gij", a, b, preferred_element_type=jnp.float32)


def _rows_mm(x3, w):
    # Weight matmul with the G graphs stacked along sublanes: (g*n, f) @ (f, h).
    g, n, f = x3.shape
    if g == 1 or n % 8 == 0:
        y = jnp.dot(x3.reshape(g * n, f), w, preferred_element_type=jnp.float32)
        return y.reshape(g, n, w.shape[1])
    # tiny pooled levels whose row count is not sublane-aligned: batched matmul
    return _bmm(x3, jnp.broadcast_to(w, (g,) + w.shape))


def _sum_last2(t):
    # sum over the trailing two axes -> (g, 1)
    return jnp.sum(jnp.sum(t, axis=2), axis=1, keepdims=True)


def _level(x, adj, conv_w, pool_w, embed_w, mask, last):
    """One DIFFPOOL level for a block of G graphs.

    conv GCN -> pool/embed GCNs (shared laplacian and lap@h) -> dense_diff_pool.
    Returns pooled x, pooled adj (None at the last level), gmp/gap readouts and
    the per-graph regularizer partials (||A - SS^T||^2 and sum(S log S)).
    """
    g, n, _ = x.shape
    c = pool_w.shape[1]

    # D^-1/2 (A + I) D^-1/2, shared by the three GCNs of this level.
    a = adj + _eye(n)[None]
    dinv = jax.lax.rsqrt(jnp.sum(a, axis=2, keepdims=True))       # (g, n, 1)
    lap = dinv * a * jnp.swapaxes(dinv, 1, 2)

    # conv GCN: h = relu(lap @ x @ conv_w)  (outer F.relu in Net is redundant)
    h = jnp.maximum(_rows_mm(_bmm(lap, x), conv_w), 0.0)          # (g, n, H)

    # pool / embed GCNs reuse lap @ h; two narrow matmuls (no lane-sliced concat)
    lh = _bmm(lap, h)
    s_raw = jnp.maximum(_rows_mm(lh, pool_w), 0.0)                # (g, n, C)
    emb = jnp.maximum(_rows_mm(lh, embed_w), 0.0)                 # (g, n, H)

    # dense_diff_pool: softmax over clusters (+ optional node mask)
    z = s_raw - jnp.max(s_raw, axis=-1, keepdims=True)
    e = jnp.exp(z)
    s = e * pl.reciprocal(jnp.sum(e, axis=-1, keepdims=True), approx=True)
    if mask is not None:
        emb = emb * mask
        s = s * mask

    out_x = _bmm_tn(s, emb)                                       # (g, C, H)
    a_s = _bmm(adj, s)                                            # (g, n, C)
    out_adj = None if last else _bmm_tn(s, a_s)                   # (g, C, C)

    # ||A - S S^T||^2 = ||A||^2 - 2 tr(S^T A S) + ||S^T S||^2  (no (n,n) SS^T)
    sts = _bmm_tn(s, s)                                           # (g, C, C)
    sq = (_sum_last2(adj * adj) - 2.0 * _sum_last2(s * a_s)
          + _sum_last2(sts * sts))                                # (g, 1)
    ent = _sum_last2(s * jnp.log(s + 1e-14))                      # (g, 1)

    ro_max = jnp.max(out_x, axis=1)                               # (g, H)  gmp
    ro_mean = jnp.sum(out_x, axis=1) * (1.0 / c)                  # (g, H)  gap
    return out_x, out_adj, ro_max, ro_mean, sq, ent


# ----------------------------------------------------------------------------
# Fused whole-network kernel (G graphs per grid step)
# ----------------------------------------------------------------------------
def _make_kernel(layout):
    def kernel(x_ref, adj_ref, mask_ref, w_ref, out_ref):
        def getw(name):
            off, r, c = layout[name]
            return w_ref[0:r, off:off + c]

        x = x_ref[...]          # (G, N, Fin)
        adj = adj_ref[...]      # (G, N, N)
        mask = mask_ref[...]    # (G, N, 1)

        x1, adj1, mx1, mn1, sq1, e1 = _level(
            x, adj, getw("conv1"), getw("pool1"), getw("emb1"), mask, last=False)
        x2, adj2, mx2, mn2, sq2, e2 = _level(
            x1, adj1, getw("conv2"), getw("pool2"), getw("emb2"), None, last=False)
        _, _, mx3, mn3, sq3, e3 = _level(
            x2, adj2, getw("conv3"), getw("pool3"), getw("emb3"), None, last=True)

        # MLP head.  lin1 split into (gmp half | gap half):
        # [max||mean] @ [Wa; Wb] == max @ Wa + mean @ Wb  -> no lane concat.
        rmax = mx1 + mx2 + mx3          # (G, H)
        rmean = mn1 + mn2 + mn3         # (G, H)
        h = jnp.maximum(
            jnp.dot(rmax, getw("lin1_max"), preferred_element_type=jnp.float32)
            + jnp.dot(rmean, getw("lin1_mean"), preferred_element_type=jnp.float32)
            + getw("lin1_b"), 0.0)
        # TODO(synk): F.dropout(p=0.5, training=True) has no deterministic
        # equivalent; implemented as eval-mode identity.
        h = jnp.maximum(
            jnp.dot(h, getw("lin2"), preferred_element_type=jnp.float32)
            + getw("lin2_b"), 0.0)
        logits = (jnp.dot(h, getw("lin3"), preferred_element_type=jnp.float32)
                  + getw("lin3_b"))

        zz = logits - jnp.max(logits, axis=-1, keepdims=True)
        logp = zz - jnp.log(jnp.sum(jnp.exp(zz), axis=-1, keepdims=True))

        # one lane-packed row per graph: [log_softmax | sq1 ent1 sq2 ent2 sq3 ent3]
        out_ref[0] = jnp.concatenate([logp, sq1, e1, sq2, e2, sq3, e3], axis=1)

    return kernel


# ----------------------------------------------------------------------------
# Wrapper: weight packing, group-size / VMEM budgeting, single pallas_call
# ----------------------------------------------------------------------------
def _pack_weights(params):
    """Pack all weights/biases into one (rows, n_blocks*128) f32 slab."""
    H = params["conv1_W"].shape[1]
    mats = [
        ("conv1", params["conv1_W"]),
        ("pool1", params["pool1_pool_W"]), ("emb1", params["pool1_embed_W"]),
        ("conv2", params["conv2_W"]),
        ("pool2", params["pool2_pool_W"]), ("emb2", params["pool2_embed_W"]),
        ("conv3", params["conv3_W"]),
        ("pool3", params["pool3_pool_W"]), ("emb3", params["pool3_embed_W"]),
        ("lin1_max", params["lin1_W"][:H]), ("lin1_mean", params["lin1_W"][H:]),
        ("lin2", params["lin2_W"]), ("lin3", params["lin3_W"]),
        ("lin1_b", params["lin1_b"]), ("lin2_b", params["lin2_b"]),
        ("lin3_b", params["lin3_b"]),
    ]
    blk = _round_up(max(int(m.shape[1]) for _, m in mats), _LANE)
    rows = _round_up(max(int(m.shape[0]) for _, m in mats), 8)
    slab = jnp.zeros((rows, blk * len(mats)), jnp.float32)
    layout = {}
    for i, (name, m) in enumerate(mats):
        r, c = int(m.shape[0]), int(m.shape[1])
        slab = slab.at[:r, i * blk:i * blk + c].set(m.astype(jnp.float32))
        layout[name] = (i * blk, r, c)
    return slab, layout


def _pick_group(batch, n_nodes, per_graph_bytes, target_rows=256,
                budget_bytes=24 << 20):
    """Largest divisor of batch that fits the row target and VMEM budget,
    keeping >= 2 grid steps (for v7x's two TensorCores) when possible."""
    cap = max(1, min(target_rows // max(n_nodes, 1),
                     budget_bytes // max(per_graph_bytes, 1)))
    g = 1
    for d in range(1, batch + 1):
        if batch % d == 0 and d <= cap:
            g = d
    if batch // g < 2:
        for d in range(g - 1, 0, -1):
            if batch % d == 0 and batch // d >= 2:
                g = d
                break
    return g


def net_forward(params, x, adj, mask):
    B, N, Fin = x.shape
    H = params["conv1_W"].shape[1]
    N1 = params["pool1_pool_W"].shape[1]
    N2 = params["pool2_pool_W"].shape[1]
    nc = params["lin3_W"].shape[1]

    slab, layout = _pack_weights(params)

    # rough per-graph live-intermediate footprint (f32) for group sizing
    per_graph = 4 * (4 * N * N + 8 * N * max(Fin, H, N1) + 4 * N1 * max(N1, H))
    G = _pick_group(B, N, per_graph)
    n_steps = B // G
    out_w = nc + 6

    mask3 = mask.reshape(B, N, 1).astype(jnp.float32)

    est = (2 * 4 * G * (N * Fin + N * N + N)       # double-buffered graph inputs
           + 2 * 4 * int(slab.size)                # weight slab
           + 2 * 4 * G * out_w                     # packed output
           + G * per_graph + (2 << 20))            # intermediates + headroom
    vmem_limit = int(min(max(est, 16 << 20), 48 << 20))

    out = pl.pallas_call(
        _make_kernel(layout),
        out_shape=jax.ShapeDtypeStruct((n_steps, G, out_w), jnp.float32),
        grid=(n_steps,),
        in_specs=[
            pl.BlockSpec((G, N, Fin), lambda b: (b, 0, 0)),
            pl.BlockSpec((G, N, N), lambda b: (b, 0, 0)),
            pl.BlockSpec((G, N, 1), lambda b: (b, 0, 0)),
            pl.BlockSpec(slab.shape, lambda b: (0, 0)),   # constant -> DMA'd once
        ],
        out_specs=pl.BlockSpec((1, G, out_w), lambda b: (b, 0, 0)),
        compiler_params=pltpu.CompilerParams(
            dimension_semantics=("parallel",),
            vmem_limit_bytes=vmem_limit),
    )(x, adj, mask3, slab)

    out = out.reshape(B, out_w)
    logp = out[:, :nc]
    sq1, e1 = out[:, nc], out[:, nc + 1]
    sq2, e2 = out[:, nc + 2], out[:, nc + 3]
    sq3, e3 = out[:, nc + 4], out[:, nc + 5]

    # reg_k = ||A_k - S_k S_k^T||_F / A_k.numel()  -  sum(S_k log S_k) / B
    # (entropy divided by s.size(0) == B, exactly as in the reference code)
    reg1 = (jnp.sqrt(jnp.maximum(jnp.sum(sq1), 0.0)) / float(B * N * N)
            - jnp.sum(e1) / float(B))
    reg2 = (jnp.sqrt(jnp.maximum(jnp.sum(sq2), 0.0)) / float(B * N1 * N1)
            - jnp.sum(e2) / float(B))
    reg3 = (jnp.sqrt(jnp.maximum(jnp.sum(sq3), 0.0)) / float(B * N2 * N2)
            - jnp.sum(e3) / float(B))
    return logp, reg1 + reg2 + reg3


# ----------------------------------------------------------------------------
if __name__ == "__main__":
    B, N, F_IN, NHID, NUM_CLASSES = 4, 16, 4, 32, 6
    RATIO = 0.5
    N1 = ceil(RATIO * N)          # 8
    N2 = ceil(RATIO ** 2 * N)     # 4
    N3 = ceil(RATIO ** 3 * N)     # 2

    key = jax.random.PRNGKey(0)
    ks = jax.random.split(key, 16)

    params = dict(
        conv1_W=jax.random.normal(ks[0], (F_IN, NHID), jnp.float32),
        pool1_pool_W=jax.random.normal(ks[1], (NHID, N1), jnp.float32),
        pool1_embed_W=jax.random.normal(ks[2], (NHID, NHID), jnp.float32),
        conv2_W=jax.random.normal(ks[3], (NHID, NHID), jnp.float32),
        pool2_pool_W=jax.random.normal(ks[4], (NHID, N2), jnp.float32),
        pool2_embed_W=jax.random.normal(ks[5], (NHID, NHID), jnp.float32),
        conv3_W=jax.random.normal(ks[6], (NHID, NHID), jnp.float32),
        pool3_pool_W=jax.random.normal(ks[7], (NHID, N3), jnp.float32),
        pool3_embed_W=jax.random.normal(ks[8], (NHID, NHID), jnp.float32),
        # torch.nn.Linear applied as x @ W + b with W stored (in, out)
        lin1_W=jax.random.normal(ks[9], (2 * NHID, NHID), jnp.float32) * 0.1,
        lin1_b=jnp.zeros((1, NHID), jnp.float32),
        lin2_W=jax.random.normal(ks[10], (NHID, NHID // 2), jnp.float32) * 0.1,
        lin2_b=jnp.zeros((1, NHID // 2), jnp.float32),
        lin3_W=jax.random.normal(ks[11], (NHID // 2, NUM_CLASSES), jnp.float32) * 0.1,
        lin3_b=jnp.zeros((1, NUM_CLASSES), jnp.float32),
    )

    # deterministic example batch (dense symmetric graphs, some padded)
    kx, ka = jax.random.split(ks[12], 2)
    x = jax.random.normal(kx, (B, N, F_IN), jnp.float32)
    a = (jax.random.uniform(ka, (B, N, N)) < 0.3).astype(jnp.float32)
    adj = jnp.maximum(a, jnp.transpose(a, (0, 2, 1)))
    adj = adj * (1.0 - jnp.eye(N, dtype=jnp.float32)[None])
    valid = jnp.array([N, 12, 16, 10])
    mask = (jnp.arange(N)[None, :] < valid[:, None]).astype(jnp.float32)  # (B, N)
    x = x * mask[:, :, None]
    adj = adj * mask[:, :, None] * mask[:, None, :]

    fwd = jax.jit(net_forward)
    logp, reg = fwd(params, x, adj, mask)
    jax.block_until_ready((logp, reg))

    assert logp.shape == (B, NUM_CLASSES)
    assert bool(jnp.all(jnp.isfinite(logp))) and bool(jnp.isfinite(reg))
    print("KERNEL_OK")
</pallas_src>

<mosaic_0001>
module attributes {stable_mosaic.version = 11 : i64} {
  func.func @kernel(%arg0: i32, %arg1: memref<2x16x4xf32, #tpu.memory_space<vmem>>, %arg2: memref<2x16x16xf32, #tpu.memory_space<vmem>>, %arg3: memref<2x16x1xf32, #tpu.memory_space<vmem>>, %arg4: memref<32x2048xf32, #tpu.memory_space<vmem>>, %arg5: memref<1x2x12xf32, #tpu.memory_space<vmem>>) attributes {dimension_semantics = [#tpu.dimension_semantics<parallel>], iteration_bounds = array<i64: 2>, scalar_prefetch = 0 : i64, scratch_operands = 0 : i64, tpu.core_type = #tpu.core_type<tc>, window_params = [{transform_indices = @transform_0, window_bounds = array<i64: 2, 16, 4>}, {transform_indices = @transform_1, window_bounds = array<i64: 2, 16, 16>}, {transform_indices = @transform_2, window_bounds = array<i64: 2, 16, 1>}, {pipeline_mode = #tpu.pipeline_mode<synchronous>, transform_indices = @transform_3, window_bounds = array<i64: 32, 2048>}, {transform_indices = @transform_4, window_bounds = array<i64: 1, 2, 12>}]} {
    %c0 = arith.constant 0 : index
    %c0_0 = arith.constant 0 : index
    %c0_1 = arith.constant 0 : index
    %0 = vector.load %arg1[%c0, %c0_0, %c0_1] : memref<2x16x4xf32, #tpu.memory_space<vmem>>, vector<2x16x4xf32>
    %c0_2 = arith.constant 0 : index
    %c0_3 = arith.constant 0 : index
    %c0_4 = arith.constant 0 : index
    %1 = vector.load %arg2[%c0_2, %c0_3, %c0_4] : memref<2x16x16xf32, #tpu.memory_space<vmem>>, vector<2x16x16xf32>
    %c0_5 = arith.constant 0 : index
    %c0_6 = arith.constant 0 : index
    %c0_7 = arith.constant 0 : index
    %2 = vector.load %arg3[%c0_5, %c0_6, %c0_7] : memref<2x16x1xf32, #tpu.memory_space<vmem>>, vector<2x16x1xf32>
    %c0_8 = arith.constant 0 : index
    %c0_9 = arith.constant 0 : index
    %3 = vector.load %arg4[%c0_8, %c0_9] : memref<32x2048xf32, #tpu.memory_space<vmem>>, vector<4x32xf32>
    %c0_10 = arith.constant 0 : index
    %c128 = arith.constant 128 : index
    %4 = vector.load %arg4[%c0_10, %c128] : memref<32x2048xf32, #tpu.memory_space<vmem>>, vector<32x8xf32>
    %c0_11 = arith.constant 0 : index
    %c256 = arith.constant 256 : index
    %5 = vector.load %arg4[%c0_11, %c256] : memref<32x2048xf32, #tpu.memory_space<vmem>>, vector<32x32xf32>
    %6 = tpu.iota {dimensions = array<i32: 0>} : vector<16x16xi32>
    %7 = tpu.iota {dimensions = array<i32: 1>} : vector<16x16xi32>
    %8 = arith.cmpi eq, %6, %7 : vector<16x16xi32>
    %9 = arith.extui %8 : vector<16x16xi1> to vector<16x16xi32>
    %10 = arith.sitofp %9 : vector<16x16xi32> to vector<16x16xf32>
    %11 = vector.shape_cast %10 : vector<16x16xf32> to vector<1x16x16xf32>
    %12 = vector.broadcast %11 : vector<1x16x16xf32> to vector<2x16x16xf32>
    %13 = arith.addf %1, %12 : vector<2x16x16xf32>
    %cst = arith.constant dense<0.000000e+00> : vector<2x16xf32>
    %14 = vector.multi_reduction <add>, %13, %cst [2] : vector<2x16x16xf32> to vector<2x16xf32>
    %15 = vector.shape_cast %14 : vector<2x16xf32> to vector<2x16x1xf32>
    %16 = math.rsqrt %15 : vector<2x16x1xf32>
    %17 = vector.broadcast %16 : vector<2x16x1xf32> to vector<2x16x16xf32>
    %18 = arith.mulf %17, %13 : vector<2x16x16xf32>
    %19 = tpu.transpose %16, [0, 2, 1] : vector<2x16x1xf32> -> vector<2x1x16xf32>
    %20 = vector.broadcast %19 : vector<2x1x16xf32> to vector<2x16x16xf32>
    %21 = arith.mulf %18, %20 : vector<2x16x16xf32>
    "tpu.trace_start"() <{level = 10 : i32, message = "gij,gjk->gik"}> : () -> ()
    %cst_12 = arith.constant dense<0.000000e+00> : vector<2x16x4xf32>
    %22 = tpu.matmul %21, %0, %cst_12 {dimension_numbers = #tpu.dot_dimension_numbers<[2], [1], [1], [2], [0, 0, 0, 1, 1, 2], [0], [0]>} : vector<2x16x16xf32>, vector<2x16x4xf32>, vector<2x16x4xf32> -> vector<2x16x4xf32>
    "tpu.trace_stop"() : () -> ()
    %23 = vector.shape_cast %22 : vector<2x16x4xf32> to vector<32x4xf32>
    %cst_13 = arith.constant dense<0.000000e+00> : vector<32x32xf32>
    %24 = tpu.matmul %23, %3, %cst_13 {dimension_numbers = #tpu.dot_dimension_numbers<[1], [0], [0], [1], [0, 0, 1, 1], [], []>} : vector<32x4xf32>, vector<4x32xf32>, vector<32x32xf32> -> vector<32x32xf32>
    %25 = vector.shape_cast %24 : vector<32x32xf32> to vector<2x16x32xf32>
    %cst_14 = arith.constant 0.000000e+00 : f32
    %26 = vector.broadcast %cst_14 : f32 to vector<2x16x32xf32>
    %27 = arith.maximumf %25, %26 : vector<2x16x32xf32>
    "tpu.trace_start"() <{level = 10 : i32, message = "gij,gjk->gik"}> : () -> ()
    %cst_15 = arith.constant dense<0.000000e+00> : vector<2x16x32xf32>
    %28 = tpu.matmul %21, %27, %cst_15 {dimension_numbers = #tpu.dot_dimension_numbers<[2], [1], [1], [2], [0, 0, 0, 1, 1, 2], [0], [0]>} : vector<2x16x16xf32>, vector<2x16x32xf32>, vector<2x16x32xf32> -> vector<2x16x32xf32>
    "tpu.trace_stop"() : () -> ()
    %29 = vector.shape_cast %28 : vector<2x16x32xf32> to vector<32x32xf32>
    %cst_16 = arith.constant dense<0.000000e+00> : vector<32x8xf32>
    %30 = tpu.matmul %29, %4, %cst_16 {dimension_numbers = #tpu.dot_dimension_numbers<[1], [0], [0], [1], [0, 0, 1, 1], [], []>} : vector<32x32xf32>, vector<32x8xf32>, vector<32x8xf32> -> vector<32x8xf32>
    %31 = vector.shape_cast %30 : vector<32x8xf32> to vector<2x16x8xf32>
    %cst_17 = arith.constant 0.000000e+00 : f32
    %32 = vector.broadcast %cst_17 : f32 to vector<2x16x8xf32>
    %33 = arith.maximumf %31, %32 : vector<2x16x8xf32>
    %34 = vector.shape_cast %28 : vector<2x16x32xf32> to vector<32x32xf32>
    %cst_18 = arith.constant dense<0.000000e+00> : vector<32x32xf32>
    %35 = tpu.matmul %34, %5, %cst_18 {dimension_numbers = #tpu.dot_dimension_numbers<[1], [0], [0], [1], [0, 0, 1, 1], [], []>} : vector<32x32xf32>, vector<32x32xf32>, vector<32x32xf32> -> vector<32x32xf32>
    %36 = vector.shape_cast %35 : vector<32x32xf32> to vector<2x16x32xf32>
    %cst_19 = arith.constant 0.000000e+00 : f32
    %37 = vector.broadcast %cst_19 : f32 to vector<2x16x32xf32>
    %38 = arith.maximumf %36, %37 : vector<2x16x32xf32>
    %cst_20 = arith.constant dense<0xFF800000> : vector<2x16xf32>
    %39 = vector.multi_reduction <maximumf>, %33, %cst_20 [2] : vector<2x16x8xf32> to vector<2x16xf32>
    %40 = vector.shape_cast %39 : vector<2x16xf32> to vector<2x16x1xf32>
    %41 = vector.broadcast %40 : vector<2x16x1xf32> to vector<2x16x8xf32>
    %42 = arith.subf %33, %41 : vector<2x16x8xf32>
    %43 = math.exp %42 : vector<2x16x8xf32>
    %cst_21 = arith.constant dense<0.000000e+00> : vector<2x16xf32>
    %44 = vector.multi_reduction <add>, %43, %cst_21 [2] : vector<2x16x8xf32> to vector<2x16xf32>
    %45 = vector.shape_cast %44 : vector<2x16xf32> to vector<2x16x1xf32>
    %46 = tpu.reciprocal %45 {approx = true} : vector<2x16x1xf32> -> vector<2x16x1xf32>
    %47 = vector.broadcast %46 : vector<2x16x1xf32> to vector<2x16x8xf32>
    %48 = arith.mulf %43, %47 : vector<2x16x8xf32>
    %49 = vector.broadcast %2 : vector<2x16x1xf32> to vector<2x16x32xf32>
    %50 = arith.mulf %38, %49 : vector<2x16x32xf32>
    %51 = vector.broadcast %2 : vector<2x16x1xf32> to vector<2x16x8xf32>
    %52 = arith.mulf %48, %51 : vector<2x16x8xf32>
    "tpu.trace_start"() <{level = 10 : i32, message = "gni,gnj->gij"}> : () -> ()
    %cst_22 = arith.constant dense<0.000000e+00> : vector<2x8x32xf32>
    %53 = tpu.matmul %52, %50, %cst_22 {dimension_numbers = #tpu.dot_dimension_numbers<[1], [1], [2], [2], [0, 0, 0, 2, 1, 2], [0], [0]>} : vector<2x16x8xf32>, vector<2x16x32xf32>, vector<2x8x32xf32> -> vector<2x8x32xf32>
    "tpu.trace_stop"() : () -> ()
    "tpu.trace_start"() <{level = 10 : i32, message = "gij,gjk->gik"}> : () -> ()
    %cst_23 = arith.constant dense<0.000000e+00> : vector<2x16x8xf32>
    %54 = tpu.matmul %1, %52, %cst_23 {dimension_numbers = #tpu.dot_dimension_numbers<[2], [1], [1], [2], [0, 0, 0, 1, 1, 2], [0], [0]>} : vector<2x16x16xf32>, vector<2x16x8xf32>, vector<2x16x8xf32> -> vector<2x16x8xf32>
    "tpu.trace_stop"() : () -> ()
    "tpu.trace_start"() <{level = 10 : i32, message = "gni,gnj->gij"}> : () -> ()
    %cst_24 = arith.constant dense<0.000000e+00> : vector<2x8x8xf32>
    %55 = tpu.matmul %52, %54, %cst_24 {dimension_numbers = #tpu.dot_dimension_numbers<[1], [1], [2], [2], [0, 0, 0, 2, 1, 2], [0], [0]>} : vector<2x16x8xf32>, vector<2x16x8xf32>, vector<2x8x8xf32> -> vector<2x8x8xf32>
    %cst_25 = arith.constant dense<0.000000e+00> : vector<2x8x8xf32>
    %56 = tpu.matmul %52, %52, %cst_25 {dimension_numbers = #tpu.dot_dimension_numbers<[1], [1], [2], [2], [0, 0, 0, 2, 1, 2], [0], [0]>} : vector<2x16x8xf32>, vector<2x16x8xf32>, vector<2x8x8xf32> -> vector<2x8x8xf32>
    "tpu.trace_stop"() : () -> ()
    %57 = arith.mulf %1, %1 : vector<2x16x16xf32>
    %cst_26 = arith.constant dense<0.000000e+00> : vector<2x16xf32>
    %58 = vector.multi_reduction <add>, %57, %cst_26 [2] : vector<2x16x16xf32> to vector<2x16xf32>
    %cst_27 = arith.constant dense<0.000000e+00> : vector<2xf32>
    %59 = vector.multi_reduction <add>, %58, %cst_27 [1] : vector<2x16xf32> to vector<2xf32>
    %60 = vector.shape_cast %59 : vector<2xf32> to vector<2x1xf32>
    %61 = arith.mulf %52, %54 : vector<2x16x8xf32>
    %cst_28 = arith.constant dense<0.000000e+00> : vector<2x16xf32>
    %62 = vector.multi_reduction <add>, %61, %cst_28 [2] : vector<2x16x8xf32> to vector<2x16xf32>
    %cst_29 = arith.constant dense<0.000000e+00> : vector<2xf32>
    %63 = vector.multi_reduction <add>, %62, %cst_29 [1] : vector<2x16xf32> to vector<2xf32>
    %64 = vector.shape_cast %63 : vector<2xf32> to vector<2x1xf32>
    %cst_30 = arith.constant 2.000000e+00 : f32
    %65 = vector.broadcast %cst_30 : f32 to vector<2x1xf32>
    %66 = arith.mulf %65, %64 : vector<2x1xf32>
    %67 = arith.subf %60, %66 : vector<2x1xf32>
    %68 = arith.mulf %56, %56 : vector<2x8x8xf32>
    %cst_31 = arith.constant dense<0.000000e+00> : vector<2x8xf32>
    %69 = vector.multi_reduction <add>, %68, %cst_31 [2] : vector<2x8x8xf32> to vector<2x8xf32>
    %cst_32 = arith.constant dense<0.000000e+00> : vector<2xf32>
    %70 = vector.multi_reduction <add>, %69, %cst_32 [1] : vector<2x8xf32> to vector<2xf32>
    %71 = vector.shape_cast %70 : vector<2xf32> to vector<2x1xf32>
    %72 = arith.addf %67, %71 : vector<2x1xf32>
    %cst_33 = arith.constant 9.99999982E-15 : f32
    %73 = vector.broadcast %cst_33 : f32 to vector<2x16x8xf32>
    %74 = arith.addf %52, %73 : vector<2x16x8xf32>
    %75 = math.log %74 : vector<2x16x8xf32>
    %76 = arith.mulf %52, %75 : vector<2x16x8xf32>
    %cst_34 = arith.constant dense<0.000000e+00> : vector<2x16xf32>
    %77 = vector.multi_reduction <add>, %76, %cst_34 [2] : vector<2x16x8xf32> to vector<2x16xf32>
    %cst_35 = arith.constant dense<0.000000e+00> : vector<2xf32>
    %78 = vector.multi_reduction <add>, %77, %cst_35 [1] : vector<2x16xf32> to vector<2xf32>
    %79 = vector.shape_cast %78 : vector<2xf32> to vector<2x1xf32>
    %cst_36 = arith.constant dense<0xFF800000> : vector<2x32xf32>
    %80 = vector.multi_reduction <maximumf>, %53, %cst_36 [1] : vector<2x8x32xf32> to vector<2x32xf32>
    %cst_37 = arith.constant dense<0.000000e+00> : vector<2x32xf32>
    %81 = vector.multi_reduction <add>, %53, %cst_37 [1] : vector<2x8x32xf32> to vector<2x32xf32>
    %cst_38 = arith.constant 1.250000e-01 : f32
    %82 = vector.broadcast %cst_38 : f32 to vector<2x32xf32>
    %83 = arith.mulf %81, %82 : vector<2x32xf32>
    %c0_39 = arith.constant 0 : index
    %c384 = arith.constant 384 : index
    %84 = vector.load %arg4[%c0_39, %c384] : memref<32x2048xf32, #tpu.memory_space<vmem>>, vector<32x32xf32>
    %c0_40 = arith.constant 0 : index
    %c512 = arith.constant 512 : index
    %85 = vector.load %arg4[%c0_40, %c512] : memref<32x2048xf32, #tpu.memory_space<vmem>>, vector<32x4xf32>
    %c0_41 = arith.constant 0 : index
    %c640 = arith.constant 640 : index
    %86 = vector.load %arg4[%c0_41, %c640] : memref<32x2048xf32, #tpu.memory_space<vmem>>, vector<32x32xf32>
    %87 = tpu.iota {dimensions = array<i32: 0>} : vector<8x8xi32>
    %88 = tpu.iota {dimensions = array<i32: 1>} : vector<8x8xi32>
    %89 = arith.cmpi eq, %87, %88 : vector<8x8xi32>
    %90 = arith.extui %89 : vector<8x8xi1> to vector<8x8xi32>
    %91 = arith.sitofp %90 : vector<8x8xi32> to vector<8x8xf32>
    %92 = vector.shape_cast %91 : vector<8x8xf32> to vector<1x8x8xf32>
    %93 = vector.broadcast %92 : vector<1x8x8xf32> to vector<2x8x8xf32>
    %94 = arith.addf %55, %93 : vector<2x8x8xf32>
    %cst_42 = arith.constant dense<0.000000e+00> : vector<2x8xf32>
    %95 = vector.multi_reduction <add>, %94, %cst_42 [2] : vector<2x8x8xf32> to vector<2x8xf32>
    %96 = vector.shape_cast %95 : vector<2x8xf32> to vector<2x8x1xf32>
    %97 = math.rsqrt %96 : vector<2x8x1xf32>
    %98 = vector.broadcast %97 : vector<2x8x1xf32> to vector<2x8x8xf32>
    %99 = arith.mulf %98, %94 : vector<2x8x8xf32>
    %100 = tpu.transpose %97, [0, 2, 1] : vector<2x8x1xf32> -> vector<2x1x8xf32>
    %101 = vector.broadcast %100 : vector<2x1x8xf32> to vector<2x8x8xf32>
    %102 = arith.mulf %99, %101 : vector<2x8x8xf32>
    "tpu.trace_start"() <{level = 10 : i32, message = "gij,gjk->gik"}> : () -> ()
    %cst_43 = arith.constant dense<0.000000e+00> : vector<2x8x32xf32>
    %103 = tpu.matmul %102, %53, %cst_43 {dimension_numbers = #tpu.dot_dimension_numbers<[2], [1], [1], [2], [0, 0, 0, 1, 1, 2], [0], [0]>} : vector<2x8x8xf32>, vector<2x8x32xf32>, vector<2x8x32xf32> -> vector<2x8x32xf32>
    "tpu.trace_stop"() : () -> ()
    %104 = vector.shape_cast %103 : vector<2x8x32xf32> to vector<16x32xf32>
    %cst_44 = arith.constant dense<0.000000e+00> : vector<16x32xf32>
    %105 = tpu.matmul %104, %84, %cst_44 {dimension_numbers = #tpu.dot_dimension_numbers<[1], [0], [0], [1], [0, 0, 1, 1], [], []>} : vector<16x32xf32>, vector<32x32xf32>, vector<16x32xf32> -> vector<16x32xf32>
    %106 = vector.shape_cast %105 : vector<16x32xf32> to vector<2x8x32xf32>
    %cst_45 = arith.constant 0.000000e+00 : f32
    %107 = vector.broadcast %cst_45 : f32 to vector<2x8x32xf32>
    %108 = arith.maximumf %106, %107 : vector<2x8x32xf32>
    "tpu.trace_start"() <{level = 10 : i32, message = "gij,gjk->gik"}> : () -> ()
    %cst_46 = arith.constant dense<0.000000e+00> : vector<2x8x32xf32>
    %109 = tpu.matmul %102, %108, %cst_46 {dimension_numbers = #tpu.dot_dimension_numbers<[2], [1], [1], [2], [0, 0, 0, 1, 1, 2], [0], [0]>} : vector<2x8x8xf32>, vector<2x8x32xf32>, vector<2x8x32xf32> -> vector<2x8x32xf32>
    "tpu.trace_stop"() : () -> ()
    %110 = vector.shape_cast %109 : vector<2x8x32xf32> to vector<16x32xf32>
    %cst_47 = arith.constant dense<0.000000e+00> : vector<16x4xf32>
    %111 = tpu.matmul %110, %85, %cst_47 {dimension_numbers = #tpu.dot_dimension_numbers<[1], [0], [0], [1], [0, 0, 1, 1], [], []>} : vector<16x32xf32>, vector<32x4xf32>, vector<16x4xf32> -> vector<16x4xf32>
    %112 = vector.shape_cast %111 : vector<16x4xf32> to vector<2x8x4xf32>
    %cst_48 = arith.constant 0.000000e+00 : f32
    %113 = vector.broadcast %cst_48 : f32 to vector<2x8x4xf32>
    %114 = arith.maximumf %112, %113 : vector<2x8x4xf32>
    %115 = vector.shape_cast %109 : vector<2x8x32xf32> to vector<16x32xf32>
    %cst_49 = arith.constant dense<0.000000e+00> : vector<16x32xf32>
    %116 = tpu.matmul %115, %86, %cst_49 {dimension_numbers = #tpu.dot_dimension_numbers<[1], [0], [0], [1], [0, 0, 1, 1], [], []>} : vector<16x32xf32>, vector<32x32xf32>, vector<16x32xf32> -> vector<16x32xf32>
    %117 = vector.shape_cast %116 : vector<16x32xf32> to vector<2x8x32xf32>
    %cst_50 = arith.constant 0.000000e+00 : f32
    %118 = vector.broadcast %cst_50 : f32 to vector<2x8x32xf32>
    %119 = arith.maximumf %117, %118 : vector<2x8x32xf32>
    %cst_51 = arith.constant dense<0xFF800000> : vector<2x8xf32>
    %120 = vector.multi_reduction <maximumf>, %114, %cst_51 [2] : vector<2x8x4xf32> to vector<2x8xf32>
    %121 = vector.shape_cast %120 : vector<2x8xf32> to vector<2x8x1xf32>
    %122 = vector.broadcast %121 : vector<2x8x1xf32> to vector<2x8x4xf32>
    %123 = arith.subf %114, %122 : vector<2x8x4xf32>
    %124 = math.exp %123 : vector<2x8x4xf32>
    %cst_52 = arith.constant dense<0.000000e+00> : vector<2x8xf32>
    %125 = vector.multi_reduction <add>, %124, %cst_52 [2] : vector<2x8x4xf32> to vector<2x8xf32>
    %126 = vector.shape_cast %125 : vector<2x8xf32> to vector<2x8x1xf32>
    %127 = tpu.reciprocal %126 {approx = true} : vector<2x8x1xf32> -> vector<2x8x1xf32>
    %128 = vector.broadcast %127 : vector<2x8x1xf32> to vector<2x8x4xf32>
    %129 = arith.mulf %124, %128 : vector<2x8x4xf32>
    "tpu.trace_start"() <{level = 10 : i32, message = "gni,gnj->gij"}> : () -> ()
    %cst_53 = arith.constant dense<0.000000e+00> : vector<2x4x32xf32>
    %130 = tpu.matmul %129, %119, %cst_53 {dimension_numbers = #tpu.dot_dimension_numbers<[1], [1], [2], [2], [0, 0, 0, 2, 1, 2], [0], [0]>} : vector<2x8x4xf32>, vector<2x8x32xf32>, vector<2x4x32xf32> -> vector<2x4x32xf32>
    "tpu.trace_stop"() : () -> ()
    "tpu.trace_start"() <{level = 10 : i32, message = "gij,gjk->gik"}> : () -> ()
    %cst_54 = arith.constant dense<0.000000e+00> : vector<2x8x4xf32>
    %131 = tpu.matmul %55, %129, %cst_54 {dimension_numbers = #tpu.dot_dimension_numbers<[2], [1], [1], [2], [0, 0, 0, 1, 1, 2], [0], [0]>} : vector<2x8x8xf32>, vector<2x8x4xf32>, vector<2x8x4xf32> -> vector<2x8x4xf32>
    "tpu.trace_stop"() : () -> ()
    "tpu.trace_start"() <{level = 10 : i32, message = "gni,gnj->gij"}> : () -> ()
    %cst_55 = arith.constant dense<0.000000e+00> : vector<2x4x4xf32>
    %132 = tpu.matmul %129, %131, %cst_55 {dimension_numbers = #tpu.dot_dimension_numbers<[1], [1], [2], [2], [0, 0, 0, 2, 1, 2], [0], [0]>} : vector<2x8x4xf32>, vector<2x8x4xf32>, vector<2x4x4xf32> -> vector<2x4x4xf32>
    %cst_56 = arith.constant dense<0.000000e+00> : vector<2x4x4xf32>
    %133 = tpu.matmul %129, %129, %cst_56 {dimension_numbers = #tpu.dot_dimension_numbers<[1], [1], [2], [2], [0, 0, 0, 2, 1, 2], [0], [0]>} : vector<2x8x4xf32>, vector<2x8x4xf32>, vector<2x4x4xf32> -> vector<2x4x4xf32>
    "tpu.trace_stop"() : () -> ()
    %134 = arith.mulf %55, %55 : vector<2x8x8xf32>
    %cst_57 = arith.constant dense<0.000000e+00> : vector<2x8xf32>
    %135 = vector.multi_reduction <add>, %134, %cst_57 [2] : vector<2x8x8xf32> to vector<2x8xf32>
    %cst_58 = arith.constant dense<0.000000e+00> : vector<2xf32>
    %136 = vector.multi_reduction <add>, %135, %cst_58 [1] : vector<2x8xf32> to vector<2xf32>
    %137 = vector.shape_cast %136 : vector<2xf32> to vector<2x1xf32>
    %138 = arith.mulf %129, %131 : vector<2x8x4xf32>
    %cst_59 = arith.constant dense<0.000000e+00> : vector<2x8xf32>
    %139 = vector.multi_reduction <add>, %138, %cst_59 [2] : vector<2x8x4xf32> to vector<2x8xf32>
    %cst_60 = arith.constant dense<0.000000e+00> : vector<2xf32>
    %140 = vector.multi_reduction <add>, %139, %cst_60 [1] : vector<2x8xf32> to vector<2xf32>
    %141 = vector.shape_cast %140 : vector<2xf32> to vector<2x1xf32>
    %cst_61 = arith.constant 2.000000e+00 : f32
    %142 = vector.broadcast %cst_61 : f32 to vector<2x1xf32>
    %143 = arith.mulf %142, %141 : vector<2x1xf32>
    %144 = arith.subf %137, %143 : vector<2x1xf32>
    %145 = arith.mulf %133, %133 : vector<2x4x4xf32>
    %cst_62 = arith.constant dense<0.000000e+00> : vector<2x4xf32>
    %146 = vector.multi_reduction <add>, %145, %cst_62 [2] : vector<2x4x4xf32> to vector<2x4xf32>
    %cst_63 = arith.constant dense<0.000000e+00> : vector<2xf32>
    %147 = vector.multi_reduction <add>, %146, %cst_63 [1] : vector<2x4xf32> to vector<2xf32>
    %148 = vector.shape_cast %147 : vector<2xf32> to vector<2x1xf32>
    %149 = arith.addf %144, %148 : vector<2x1xf32>
    %cst_64 = arith.constant 9.99999982E-15 : f32
    %150 = vector.broadcast %cst_64 : f32 to vector<2x8x4xf32>
    %151 = arith.addf %129, %150 : vector<2x8x4xf32>
    %152 = math.log %151 : vector<2x8x4xf32>
    %153 = arith.mulf %129, %152 : vector<2x8x4xf32>
    %cst_65 = arith.constant dense<0.000000e+00> : vector<2x8xf32>
    %154 = vector.multi_reduction <add>, %153, %cst_65 [2] : vector<2x8x4xf32> to vector<2x8xf32>
    %cst_66 = arith.constant dense<0.000000e+00> : vector<2xf32>
    %155 = vector.multi_reduction <add>, %154, %cst_66 [1] : vector<2x8xf32> to vector<2xf32>
    %156 = vector.shape_cast %155 : vector<2xf32> to vector<2x1xf32>
    %cst_67 = arith.constant dense<0xFF800000> : vector<2x32xf32>
    %157 = vector.multi_reduction <maximumf>, %130, %cst_67 [1] : vector<2x4x32xf32> to vector<2x32xf32>
    %cst_68 = arith.constant dense<0.000000e+00> : vector<2x32xf32>
    %158 = vector.multi_reduction <add>, %130, %cst_68 [1] : vector<2x4x32xf32> to vector<2x32xf32>
    %cst_69 = arith.constant 2.500000e-01 : f32
    %159 = vector.broadcast %cst_69 : f32 to vector<2x32xf32>
    %160 = arith.mulf %158, %159 : vector<2x32xf32>
    %c0_70 = arith.constant 0 : index
    %c768 = arith.constant 768 : index
    %161 = vector.load %arg4[%c0_70, %c768] : memref<32x2048xf32, #tpu.memory_space<vmem>>, vector<32x32xf32>
    %c0_71 = arith.constant 0 : index
    %c896 = arith.constant 896 : index
    %162 = vector.load %arg4[%c0_71, %c896] : memref<32x2048xf32, #tpu.memory_space<vmem>>, vector<32x2xf32>
    %c0_72 = arith.constant 0 : index
    %c1024 = arith.constant 1024 : index
    %163 = vector.load %arg4[%c0_72, %c1024] : memref<32x2048xf32, #tpu.memory_space<vmem>>, vector<32x32xf32>
    %164 = tpu.iota {dimensions = array<i32: 0>} : vector<4x4xi32>
    %165 = tpu.iota {dimensions = array<i32: 1>} : vector<4x4xi32>
    %166 = arith.cmpi eq, %164, %165 : vector<4x4xi32>
    %167 = arith.extui %166 : vector<4x4xi1> to vector<4x4xi32>
    %168 = arith.sitofp %167 : vector<4x4xi32> to vector<4x4xf32>
    %169 = vector.shape_cast %168 : vector<4x4xf32> to vector<1x4x4xf32>
    %170 = vector.broadcast %169 : vector<1x4x4xf32> to vector<2x4x4xf32>
    %171 = arith.addf %132, %170 : vector<2x4x4xf32>
    %cst_73 = arith.constant dense<0.000000e+00> : vector<2x4xf32>
    %172 = vector.multi_reduction <add>, %171, %cst_73 [2] : vector<2x4x4xf32> to vector<2x4xf32>
    %173 = vector.shape_cast %172 : vector<2x4xf32> to vector<2x4x1xf32>
    %174 = math.rsqrt %173 : vector<2x4x1xf32>
    %175 = vector.broadcast %174 : vector<2x4x1xf32> to vector<2x4x4xf32>
    %176 = arith.mulf %175, %171 : vector<2x4x4xf32>
    %177 = tpu.transpose %174, [0, 2, 1] : vector<2x4x1xf32> -> vector<2x1x4xf32>
    %178 = vector.broadcast %177 : vector<2x1x4xf32> to vector<2x4x4xf32>
    %179 = arith.mulf %176, %178 : vector<2x4x4xf32>
    "tpu.trace_start"() <{level = 10 : i32, message = "gij,gjk->gik"}> : () -> ()
    %cst_74 = arith.constant dense<0.000000e+00> : vector<2x4x32xf32>
    %180 = tpu.matmul %179, %130, %cst_74 {dimension_numbers = #tpu.dot_dimension_numbers<[2], [1], [1], [2], [0, 0, 0, 1, 1, 2], [0], [0]>} : vector<2x4x4xf32>, vector<2x4x32xf32>, vector<2x4x32xf32> -> vector<2x4x32xf32>
    "tpu.trace_stop"() : () -> ()
    %181 = vector.shape_cast %161 : vector<32x32xf32> to vector<1x32x32xf32>
    %182 = vector.broadcast %181 : vector<1x32x32xf32> to vector<2x32x32xf32>
    "tpu.trace_start"() <{level = 10 : i32, message = "gij,gjk->gik"}> : () -> ()
    %cst_75 = arith.constant dense<0.000000e+00> : vector<2x4x32xf32>
    %183 = tpu.matmul %180, %182, %cst_75 {dimension_numbers = #tpu.dot_dimension_numbers<[2], [1], [1], [2], [0, 0, 0, 1, 1, 2], [0], [0]>} : vector<2x4x32xf32>, vector<2x32x32xf32>, vector<2x4x32xf32> -> vector<2x4x32xf32>
    "tpu.trace_stop"() : () -> ()
    %cst_76 = arith.constant 0.000000e+00 : f32
    %184 = vector.broadcast %cst_76 : f32 to vector<2x4x32xf32>
    %185 = arith.maximumf %183, %184 : vector<2x4x32xf32>
    "tpu.trace_start"() <{level = 10 : i32, message = "gij,gjk->gik"}> : () -> ()
    %cst_77 = arith.constant dense<0.000000e+00> : vector<2x4x32xf32>
    %186 = tpu.matmul %179, %185, %cst_77 {dimension_numbers = #tpu.dot_dimension_numbers<[2], [1], [1], [2], [0, 0, 0, 1, 1, 2], [0], [0]>} : vector<2x4x4xf32>, vector<2x4x32xf32>, vector<2x4x32xf32> -> vector<2x4x32xf32>
    "tpu.trace_stop"() : () -> ()
    %187 = vector.shape_cast %162 : vector<32x2xf32> to vector<1x32x2xf32>
    %188 = vector.broadcast %187 : vector<1x32x2xf32> to vector<2x32x2xf32>
    "tpu.trace_start"() <{level = 10 : i32, message = "gij,gjk->gik"}> : () -> ()
    %cst_78 = arith.constant dense<0.000000e+00> : vector<2x4x2xf32>
    %189 = tpu.matmul %186, %188, %cst_78 {dimension_numbers = #tpu.dot_dimension_numbers<[2], [1], [1], [2], [0, 0, 0, 1, 1, 2], [0], [0]>} : vector<2x4x32xf32>, vector<2x32x2xf32>, vector<2x4x2xf32> -> vector<2x4x2xf32>
    "tpu.trace_stop"() : () -> ()
    %cst_79 = arith.constant 0.000000e+00 : f32
    %190 = vector.broadcast %cst_79 : f32 to vector<2x4x2xf32>
    %191 = arith.maximumf %189, %190 : vector<2x4x2xf32>
    %192 = vector.shape_cast %163 : vector<32x32xf32> to vector<1x32x32xf32>
    %193 = vector.broadcast %192 : vector<1x32x32xf32> to vector<2x32x32xf32>
    "tpu.trace_start"() <{level = 10 : i32, message = "gij,gjk->gik"}> : () -> ()
    %cst_80 = arith.constant dense<0.000000e+00> : vector<2x4x32xf32>
    %194 = tpu.matmul %186, %193, %cst_80 {dimension_numbers = #tpu.dot_dimension_numbers<[2], [1], [1], [2], [0, 0, 0, 1, 1, 2], [0], [0]>} : vector<2x4x32xf32>, vector<2x32x32xf32>, vector<2x4x32xf32> -> vector<2x4x32xf32>
    "tpu.trace_stop"() : () -> ()
    %cst_81 = arith.constant 0.000000e+00 : f32
    %195 = vector.broadcast %cst_81 : f32 to vector<2x4x32xf32>
    %196 = arith.maximumf %194, %195 : vector<2x4x32xf32>
    %cst_82 = arith.constant dense<0xFF800000> : vector<2x4xf32>
    %197 = vector.multi_reduction <maximumf>, %191, %cst_82 [2] : vector<2x4x2xf32> to vector<2x4xf32>
    %198 = vector.shape_cast %197 : vector<2x4xf32> to vector<2x4x1xf32>
    %199 = vector.broadcast %198 : vector<2x4x1xf32> to vector<2x4x2xf32>
    %200 = arith.subf %191, %199 : vector<2x4x2xf32>
    %201 = math.exp %200 : vector<2x4x2xf32>
    %cst_83 = arith.constant dense<0.000000e+00> : vector<2x4xf32>
    %202 = vector.multi_reduction <add>, %201, %cst_83 [2] : vector<2x4x2xf32> to vector<2x4xf32>
    %203 = vector.shape_cast %202 : vector<2x4xf32> to vector<2x4x1xf32>
    %204 = tpu.reciprocal %203 {approx = true} : vector<2x4x1xf32> -> vector<2x4x1xf32>
    %205 = vector.broadcast %204 : vector<2x4x1xf32> to vector<2x4x2xf32>
    %206 = arith.mulf %201, %205 : vector<2x4x2xf32>
    "tpu.trace_start"() <{level = 10 : i32, message = "gni,gnj->gij"}> : () -> ()
    %cst_84 = arith.constant dense<0.000000e+00> : vector<2x2x32xf32>
    %207 = tpu.matmul %206, %196, %cst_84 {dimension_numbers = #tpu.dot_dimension_numbers<[1], [1], [2], [2], [0, 0, 0, 2, 1, 2], [0], [0]>} : vector<2x4x2xf32>, vector<2x4x32xf32>, vector<2x2x32xf32> -> vector<2x2x32xf32>
    "tpu.trace_stop"() : () -> ()
    "tpu.trace_start"() <{level = 10 : i32, message = "gij,gjk->gik"}> : () -> ()
    %cst_85 = arith.constant dense<0.000000e+00> : vector<2x4x2xf32>
    %208 = tpu.matmul %132, %206, %cst_85 {dimension_numbers = #tpu.dot_dimension_numbers<[2], [1], [1], [2], [0, 0, 0, 1, 1, 2], [0], [0]>} : vector<2x4x4xf32>, vector<2x4x2xf32>, vector<2x4x2xf32> -> vector<2x4x2xf32>
    "tpu.trace_stop"() : () -> ()
    "tpu.trace_start"() <{level = 10 : i32, message = "gni,gnj->gij"}> : () -> ()
    %cst_86 = arith.constant dense<0.000000e+00> : vector<2x2x2xf32>
    %209 = tpu.matmul %206, %206, %cst_86 {dimension_numbers = #tpu.dot_dimension_numbers<[1], [1], [2], [2], [0, 0, 0, 2, 1, 2], [0], [0]>} : vector<2x4x2xf32>, vector<2x4x2xf32>, vector<2x2x2xf32> -> vector<2x2x2xf32>
    "tpu.trace_stop"() : () -> ()
    %210 = arith.mulf %132, %132 : vector<2x4x4xf32>
    %cst_87 = arith.constant dense<0.000000e+00> : vector<2x4xf32>
    %211 = vector.multi_reduction <add>, %210, %cst_87 [2] : vector<2x4x4xf32> to vector<2x4xf32>
    %cst_88 = arith.constant dense<0.000000e+00> : vector<2xf32>
    %212 = vector.multi_reduction <add>, %211, %cst_88 [1] : vector<2x4xf32> to vector<2xf32>
    %213 = vector.shape_cast %212 : vector<2xf32> to vector<2x1xf32>
    %214 = arith.mulf %206, %208 : vector<2x4x2xf32>
    %cst_89 = arith.constant dense<0.000000e+00> : vector<2x4xf32>
    %215 = vector.multi_reduction <add>, %214, %cst_89 [2] : vector<2x4x2xf32> to vector<2x4xf32>
    %cst_90 = arith.constant dense<0.000000e+00> : vector<2xf32>
    %216 = vector.multi_reduction <add>, %215, %cst_90 [1] : vector<2x4xf32> to vector<2xf32>
    %217 = vector.shape_cast %216 : vector<2xf32> to vector<2x1xf32>
    %cst_91 = arith.constant 2.000000e+00 : f32
    %218 = vector.broadcast %cst_91 : f32 to vector<2x1xf32>
    %219 = arith.mulf %218, %217 : vector<2x1xf32>
    %220 = arith.subf %213, %219 : vector<2x1xf32>
    %221 = arith.mulf %209, %209 : vector<2x2x2xf32>
    %cst_92 = arith.constant dense<0.000000e+00> : vector<2x2xf32>
    %222 = vector.multi_reduction <add>, %221, %cst_92 [2] : vector<2x2x2xf32> to vector<2x2xf32>
    %cst_93 = arith.constant dense<0.000000e+00> : vector<2xf32>
    %223 = vector.multi_reduction <add>, %222, %cst_93 [1] : vector<2x2xf32> to vector<2xf32>
    %224 = vector.shape_cast %223 : vector<2xf32> to vector<2x1xf32>
    %225 = arith.addf %220, %224 : vector<2x1xf32>
    %cst_94 = arith.constant 9.99999982E-15 : f32
    %226 = vector.broadcast %cst_94 : f32 to vector<2x4x2xf32>
    %227 = arith.addf %206, %226 : vector<2x4x2xf32>
    %228 = math.log %227 : vector<2x4x2xf32>
    %229 = arith.mulf %206, %228 : vector<2x4x2xf32>
    %cst_95 = arith.constant dense<0.000000e+00> : vector<2x4xf32>
    %230 = vector.multi_reduction <add>, %229, %cst_95 [2] : vector<2x4x2xf32> to vector<2x4xf32>
    %cst_96 = arith.constant dense<0.000000e+00> : vector<2xf32>
    %231 = vector.multi_reduction <add>, %230, %cst_96 [1] : vector<2x4xf32> to vector<2xf32>
    %232 = vector.shape_cast %231 : vector<2xf32> to vector<2x1xf32>
    %cst_97 = arith.constant dense<0xFF800000> : vector<2x32xf32>
    %233 = vector.multi_reduction <maximumf>, %207, %cst_97 [1] : vector<2x2x32xf32> to vector<2x32xf32>
    %cst_98 = arith.constant dense<0.000000e+00> : vector<2x32xf32>
    %234 = vector.multi_reduction <add>, %207, %cst_98 [1] : vector<2x2x32xf32> to vector<2x32xf32>
    %cst_99 = arith.constant 5.000000e-01 : f32
    %235 = vector.broadcast %cst_99 : f32 to vector<2x32xf32>
    %236 = arith.mulf %234, %235 : vector<2x32xf32>
    %237 = arith.addf %80, %157 : vector<2x32xf32>
    %238 = arith.addf %237, %233 : vector<2x32xf32>
    %239 = arith.addf %83, %160 : vector<2x32xf32>
    %240 = arith.addf %239, %236 : vector<2x32xf32>
    %c0_100 = arith.constant 0 : index
    %c1152 = arith.constant 1152 : index
    %241 = vector.load %arg4[%c0_100, %c1152] : memref<32x2048xf32, #tpu.memory_space<vmem>>, vector<32x32xf32>
    %cst_101 = arith.constant dense<0.000000e+00> : vector<2x32xf32>
    %242 = tpu.matmul %238, %241, %cst_101 {dimension_numbers = #tpu.dot_dimension_numbers<[1], [0], [0], [1], [0, 0, 1, 1], [], []>} : vector<2x32xf32>, vector<32x32xf32>, vector<2x32xf32> -> vector<2x32xf32>
    %c0_102 = arith.constant 0 : index
    %c1280 = arith.constant 1280 : index
    %243 = vector.load %arg4[%c0_102, %c1280] : memref<32x2048xf32, #tpu.memory_space<vmem>>, vector<32x32xf32>
    %cst_103 = arith.constant dense<0.000000e+00> : vector<2x32xf32>
    %244 = tpu.matmul %240, %243, %cst_103 {dimension_numbers = #tpu.dot_dimension_numbers<[1], [0], [0], [1], [0, 0, 1, 1], [], []>} : vector<2x32xf32>, vector<32x32xf32>, vector<2x32xf32> -> vector<2x32xf32>
    %245 = arith.addf %242, %244 : vector<2x32xf32>
    %c0_104 = arith.constant 0 : index
    %c1664 = arith.constant 1664 : index
    %246 = vector.load %arg4[%c0_104, %c1664] : memref<32x2048xf32, #tpu.memory_space<vmem>>, vector<1x32xf32>
    %247 = vector.broadcast %246 : vector<1x32xf32> to vector<2x32xf32>
    %248 = arith.addf %245, %247 : vector<2x32xf32>
    %cst_105 = arith.constant 0.000000e+00 : f32
    %249 = vector.broadcast %cst_105 : f32 to vector<2x32xf32>
    %250 = arith.maximumf %248, %249 : vector<2x32xf32>
    %c0_106 = arith.constant 0 : index
    %c1408 = arith.constant 1408 : index
    %251 = vector.load %arg4[%c0_106, %c1408] : memref<32x2048xf32, #tpu.memory_space<vmem>>, vector<32x16xf32>
    %cst_107 = arith.constant dense<0.000000e+00> : vector<2x16xf32>
    %252 = tpu.matmul %250, %251, %cst_107 {dimension_numbers = #tpu.dot_dimension_numbers<[1], [0], [0], [1], [0, 0, 1, 1], [], []>} : vector<2x32xf32>, vector<32x16xf32>, vector<2x16xf32> -> vector<2x16xf32>
    %c0_108 = arith.constant 0 : index
    %c1792 = arith.constant 1792 : index
    %253 = vector.load %arg4[%c0_108, %c1792] : memref<32x2048xf32, #tpu.memory_space<vmem>>, vector<1x16xf32>
    %254 = vector.broadcast %253 : vector<1x16xf32> to vector<2x16xf32>
    %255 = arith.addf %252, %254 : vector<2x16xf32>
    %cst_109 = arith.constant 0.000000e+00 : f32
    %256 = vector.broadcast %cst_109 : f32 to vector<2x16xf32>
    %257 = arith.maximumf %255, %256 : vector<2x16xf32>
    %c0_110 = arith.constant 0 : index
    %c1536 = arith.constant 1536 : index
    %258 = vector.load %arg4[%c0_110, %c1536] : memref<32x2048xf32, #tpu.memory_space<vmem>>, vector<16x6xf32>
    %cst_111 = arith.constant dense<0.000000e+00> : vector<2x6xf32>
    %259 = tpu.matmul %257, %258, %cst_111 {dimension_numbers = #tpu.dot_dimension_numbers<[1], [0], [0], [1], [0, 0, 1, 1], [], []>} : vector<2x16xf32>, vector<16x6xf32>, vector<2x6xf32> -> vector<2x6xf32>
    %c0_112 = arith.constant 0 : index
    %c1920 = arith.constant 1920 : index
    %260 = vector.load %arg4[%c0_112, %c1920] : memref<32x2048xf32, #tpu.memory_space<vmem>>, vector<1x6xf32>
    %261 = vector.broadcast %260 : vector<1x6xf32> to vector<2x6xf32>
    %262 = arith.addf %259, %261 : vector<2x6xf32>
    %cst_113 = arith.constant dense<0xFF800000> : vector<2xf32>
    %263 = vector.multi_reduction <maximumf>, %262, %cst_113 [1] : vector<2x6xf32> to vector<2xf32>
    %264 = vector.shape_cast %263 : vector<2xf32> to vector<2x1xf32>
    %265 = vector.broadcast %264 : vector<2x1xf32> to vector<2x6xf32>
    %266 = arith.subf %262, %265 : vector<2x6xf32>
    %267 = math.exp %266 : vector<2x6xf32>
    %cst_114 = arith.constant dense<0.000000e+00> : vector<2xf32>
    %268 = vector.multi_reduction <add>, %267, %cst_114 [1] : vector<2x6xf32> to vector<2xf32>
    %269 = vector.shape_cast %268 : vector<2xf32> to vector<2x1xf32>
    %270 = math.log %269 : vector<2x1xf32>
    %271 = vector.broadcast %270 : vector<2x1xf32> to vector<2x6xf32>
    %272 = arith.subf %266, %271 : vector<2x6xf32>
    %273 = tpu.concatenate %272, %72, %79, %149, %156, %225, %232 in 1 : vector<2x6xf32>, vector<2x1xf32>, vector<2x1xf32>, vector<2x1xf32>, vector<2x1xf32>, vector<2x1xf32>, vector<2x1xf32> -> vector<2x12xf32>
    %c0_115 = arith.constant 0 : index
    %c0_116 = arith.constant 0 : index
    %c0_117 = arith.constant 0 : index
    %274 = vector.load %arg5[%c0_115, %c0_116, %c0_117] : memref<1x2x12xf32, #tpu.memory_space<vmem>>, vector<1x2x12xf32>
    %275 = vector.shape_cast %274 : vector<1x2x12xf32> to vector<2x12xf32>
    %276 = vector.shape_cast %273 : vector<2x12xf32> to vector<1x2x12xf32>
    tpu.vector_store %arg5[%c0_115, %c0_116, %c0_117], %276 {strides = array<i32>} : memref<1x2x12xf32, #tpu.memory_space<vmem>>, vector<1x2x12xf32>,
    return
  }
  func.func @transform_0(%arg0: i32) -> (i32, i32, i32) {
    %c0_i32 = arith.constant 0 : i32
    %c0_i32_0 = arith.constant 0 : i32
    %c0_i32_1 = arith.constant 0 : i32
    return %arg0, %c0_i32, %c0_i32_0 : i32, i32, i32
  }
  func.func @transform_1(%arg0: i32) -> (i32, i32, i32) {
    %c0_i32 = arith.constant 0 : i32
    %c0_i32_0 = arith.constant 0 : i32
    %c0_i32_1 = arith.constant 0 : i32
    return %arg0, %c0_i32, %c0_i32_0 : i32, i32, i32
  }
  func.func @transform_2(%arg0: i32) -> (i32, i32, i32) {
    %c0_i32 = arith.constant 0 : i32
    %c0_i32_0 = arith.constant 0 : i32
    %c0_i32_1 = arith.constant 0 : i32
    return %arg0, %c0_i32, %c0_i32_0 : i32, i32, i32
  }
  func.func @transform_3(%arg0: i32) -> (i32, i32) {
    %c0_i32 = arith.constant 0 : i32
    %c0_i32_0 = arith.constant 0 : i32
    %c0_i32_1 = arith.constant 0 : i32
    return %c0_i32, %c0_i32_0 : i32, i32
  }
  func.func @transform_4(%arg0: i32) -> (i32, i32, i32) {
    %c0_i32 = arith.constant 0 : i32
    %c0_i32_0 = arith.constant 0 : i32
    %c0_i32_1 = arith.constant 0 : i32
    return %arg0, %c0_i32, %c0_i32_0 : i32, i32, i32
  }
}

</mosaic_0001>

<bundles_post_ra>
// kernel: net_forward.1
= control target key start
LH: loop header
LB: loop body
LE: loop exit
PB: predicated region body
PF: predicated region fallthrough
CT: control target
= control target key end

     0   :  { %s6028_s15 = smov 0   ;;  %s6819_s0 = inlined_call_operand.vmem [shape: f32[4,16,4], index: 0, kind: input, shape index: {}]   ;;  %s6820_s1 = inlined_call_operand.vmem [shape: f32[4,16,16], index: 1, kind: input, shape index: {}]   ;;  %s6821_s2 = inlined_call_operand.vmem [shape: f32[4,16,1], index: 2, kind: input, shape index: {}]   ;;  %s6822_s3 = inlined_call_operand.vmem [shape: f32[32,2048], index: 3, kind: input, shape index: {}]   ;;  %s6823_s4 = inlined_call_operand.vmem [shape: f32[2,2,12], index: 4, kind: output, shape index: {}]  }
   0x1 LB: > { %s6034_s16 = sadd.s32 4294967295, %s5998_s15   ;;  %p5268_p0 = scmp.ge.s32.totalorder %s5998_s15, 1  ;;  %s5998_s15 = sphi %s6028_s15, %s14_s15  }
   0x2   : > { %p188_p1 = scmp.lt.s32.totalorder %s5998_s15, 3 }
   0x4   : > { %p189_p2 = pnand %p5268_p0, %p188_p1 }
   0x5   : > { %s5269_s17 = sshll.u32 (!%p189_p2), %s6034_s16, 1  ;;  %p247_p4 = scmp.lt.s32.totalorder (!%p189_p2), %s6034_s16, 1 }
   0x6   : > { %192 = sbr.rel (%p189_p2) target bundleno = 6451 (0x1933), region = 36  ;;  %p227_p3 = scmp.lt.s32.totalorder (!%p189_p2), %s5269_s17, 3 }
   0xb   : > { %v272_v0 = vlaneseq  ;;  %s6825_s17 = smov (!%p227_p3, %s5269_s17), 3  ;;  %v6000_v4 = vmov 0.0   ;;  %vm287_vm2 = vcmask 130048   ;;  %v263_v44 = vld [vmem:[%s6822_s3] sm:$0xf]  ;;  %vm559_vm3 = vcmask 1043456  }
   0xc   : > { %s6046_s18 = sshll.u32 %s6825_s17, 4  ;;  %vm546_vm4 = vcmask 31744   ;;  %v267_v49 = vld [vmem:[%s6822_s3 + $0x188] sm:$0xff]  ;;  %v271_v59 = vld [vmem:[%s6822_s3 + $0x190] sm:$0xff]  ;;  %vm802_vm5 = vcmask 261120   ;;  %vm993_vm6 = vcmask 64512  }
   0xd   : > { %v6039_v1 = vshrl.u32 %v272_v0, 7  ;;  %v6041_v2 = vand.u32 127, %v272_v0  ;;  %s6055_s21 = scalar_lea.vmem %s6820_s1, %s6046_s18  ;;  %s231_s24 = scalar_lea.vmem %s6819_s0, %s6046_s18  ;;  %v266_v50 = vld [vmem:[%s6822_s3 + $0x108] sm:$0xff]  ;;  %v270_v60 = vld [vmem:[%s6822_s3 + $0x110] sm:$0xff]  ;;  %vm6002_vm7 = vmmov 0   ;;  %vm3308_vm8 = vcmask 257024  }
   0xe   : > { %v6059_v6 = vld [vmem:[%s6055_s21 + $0x10] sm:$0xff]  ;;  %v6062_v7 = vld [vmem:[%s6055_s21] sm:$0xff]  ;;  %v6065_v8 = vld [vmem:[%s6055_s21 + $0x18] sm:$0xff]  ;;  %s245_s23 = scalar_lea.vmem %s6821_s2, %s6046_s18  ;;  %vm3255_vm9 = vcmask 27648   ;;  %vm4173_vm10 = vcmask 11264   ;;  %vm4806_vm11 = vcmask 254976  }
   0xf   : > { %vm277_vm0 = vcmp.eq.s32.totalorder %v6039_v1, %v6041_v2  ;;  %v274_v3 = vadd.s32 8, %v6039_v1  ;;  %v6074_v13 = vld [vmem:[%s6055_s21 + $0x8] sm:$0xff]  ;;  %v254_v24 = vld [vmem:[%s231_s24 + $0x18] sm:$0xff]  ;;  %v251_v27 = vld [vmem:[%s231_s24] sm:$0xff]  ;;  %v6086_v31 = vsub.s32 0, %v6039_v1  ;;  %vm1758_vm12 = vcmask 1041409  }
  0x10   : > { %v6049_v5 = vsel %vm277_vm0, 1.0, %v6000_v4  ;;  %v252_v23 = vld [vmem:[%s231_s24 + $0x8] sm:$0xff]  ;;  %5545 = vmatprep.subr.mxu1 %v254_v24  ;;  %v253_v28 = vld [vmem:[%s231_s24 + $0x10] sm:$0xff]  ;;  %vm4754_vm13 = vcmask 9216   ;;  %vm5161_vm14 = vcmask 41984   ;;  %vm1747_vm15 = vcmask 130112  }
  0x11   : > { %vm278_vm1 = vcmp.eq.s32.totalorder %v274_v3, %v6041_v2  ;;  %v285_v10 = vadd.f32 %v6049_v5, %v6059_v6  ;;  %v283_v11 = vadd.f32 %v6049_v5, %v6062_v7  ;;  %5538 = vmatprep.subr.mxu0 %v252_v23  ;;  %5546 = vmatpush3.msra.mxu1 %v254_v24  ;;  %v265_v61 = vld [vmem:[%s6822_s3 + $0x88] sm:$0xff]  ;;  %v269_v62 = vld [vmem:[%s6822_s3 + $0x90] sm:$0xff]  ;;  %v6001_v24 = vmov 0   ;;  %s6827_s16 = smov (!%p247_p4, %s6034_s16), 1 }
  0x12   : > { %v5280_v9 = vsel %vm278_vm1, 1.0, %v6000_v4  ;;  %5539 = vmatpush3.msra.mxu0 %v252_v23  ;;  %5547 = vmatprep.subr.mxu1 %v253_v28  ;;  %v264_v63 = vld [vmem:[%s6822_s3 + $0x8] sm:$0xff]  ;;  %v268_v0 = vld [vmem:[%s6822_s3 + $0x10] sm:$0xff]  ;;  %vm1761_vm0 = vcmask 123904   ;;  %vm1830_vm1 = vcmask 58368   ;;  %s5278_s8 = sshll.u32 %s6827_s16, 1 }
  0x13   : > { %v286_v12 = vadd.f32 %v5280_v9, %v6065_v8  ;;  %v284_v14 = vadd.f32 %v5280_v9, %v6074_v13  ;;  %v294_v15 = vsel %vm287_vm2, %v285_v10, 0.0  ;;  %v288_v16 = vsel %vm287_vm2, %v283_v11, 0.0  ;;  %5540 = vmatprep.subr.mxu0 %v251_v27  ;;  %5548 = vmatpush3.msra.mxu1 %v253_v28  ;;  %s250_s11 = scalar_lea.vmem %s6823_s4, %s5278_s8 }
  0x14   : > { %295 = vadd.xlane.f32.xlu1 %v294_v15  ;;  %289 = vadd.xlane.f32.xlu0 %v288_v16 }
  0x15   : > { %v297_v17 = vsel %vm287_vm2, %v286_v12, 0.0  ;;  %v291_v18 = vsel %vm287_vm2, %v284_v14, 0.0  ;;  %5541 = vmatpush3.msra.mxu0 %v251_v27 }
  0x16   : > { %5552 = vmatprep.subr.msk.mxu0 %vm559_vm3, %v263_v44 }
  0x18   : > { %298 = vadd.xlane.f32.xlu1 %v297_v17  ;;  %292 = vadd.xlane.f32.xlu0 %v291_v18 }
  0x9d   : > { %v296_v19 = vpop.xlane.xlu1 %295  ;;  %v290_v20 = vpop.xlane.xlu0 %289 }
  0x9e   : > { %5920 = vrsqrt.f32 %v296_v19 }
  0x9f   : > { %5922 = vrsqrt.f32 %v290_v20 }
  0xa1   : > { %v299_v21 = vpop.xlane.xlu1 %298  ;;  %v293_v22 = vpop.xlane.xlu0 %292 }
  0xa2   : > { %5924 = vrsqrt.f32 %v299_v21 }
  0xa3   : > { %5926 = vrsqrt.f32 %v293_v22 }
  0xab   : > { %v5921_v25 = vpop.eup %5920 }
  0xac   : > { %v5923_v26 = vpop.eup %5922  ;;  %340 = vxpose.xlu1.b32.start [1/2] (short) (narrow) %v5921_v25, 8  ;;  %v306_v36 = vmul.f32 %v5921_v25, %v285_v10 }
  0xad   : > { %308 = vxpose.xlu0.b32.start [1/2] (short) (narrow) %v5923_v26, 8  ;;  %v304_v39 = vmul.f32 %v5923_v26, %v283_v11 }
  0xaf   : > { %v5925_v29 = vpop.eup %5924 }
  0xb0   : > { %v5927_v30 = vpop.eup %5926  ;;  %341 = vxpose.xlu1.b32.end [2/2] (short) (narrow) %v5925_v29, 8  ;;  %v307_v33 = vmul.f32 %v5925_v29, %v286_v12 }
  0xb1   : > { %309 = vxpose.xlu0.b32.end [2/2] (short) (narrow) %v5927_v30, 8  ;;  %v305_v37 = vmul.f32 %v5927_v30, %v284_v14 }
  0xce   : > { %5919 = vset.pattern.permute.xlu1 %v6001_v24 }
  0xda   : > { %5918 = vset.pattern.permute.xlu0 %v6001_v24 }
 0x128   : > { %v356_v32 = vpop.trf.xlu1 }
 0x129   : > { %v379_v34 = vrot.slane %v356_v32, %v6086_v31  ;;  %v324_v35 = vpop.trf.xlu0 }
 0x12a   : > { %v375_v38 = vrot.slane %v324_v35, %v6086_v31 }
 0x12b   : > { %v383_v40 = vmul.f32 %v379_v34, %v307_v33  ;;  %v382_v41 = vmul.f32 %v379_v34, %v306_v36 }
 0x12c   : > { %v381_v42 = vmul.f32 %v375_v38, %v305_v37  ;;  %v380_v43 = vmul.f32 %v375_v38, %v304_v39 }
 0x12d   : > { %5549 = vmatprep.mubr.msk.f32.mxu1 %vm287_vm2, %v382_v41 }
 0x12e   : > { %5542 = vmatprep.mubr.msk.f32.mxu0 %vm287_vm2, %v380_v43  ;;  %5550 = vmatmul.mubr.msk.f32.vlgmr.msra.gmra.mxu1 %vm287_vm2, %v383_v40 }
 0x12f   : > { %5543 = vmatmul.mubr.msk.f32.vlgmr.msra.gmra.mxu0 %vm287_vm2, %v381_v42  ;;  %5564 = vmatprep.mubr.msk.f32.mxu1 %vm287_vm2, %v380_v43 }
 0x130   : > { %5553 = vmatpush3.msk.msra.mxu0 %vm559_vm3, %v263_v44 }
 0x131   : > { %5574 = vmatprep.subr.mxu0 %v267_v49 }
 0x1ee   : > { %v5551_v46 = vpop.f32.mrf.mxu1 }
 0x1ef   : > { %v5544_v45 = vpop.f32.mrf.mxu0 }
 0x1f0   : > { %v537_v48 = vpop.f32.mrf.mxu1 }
 0x1f1   : > { %v456_v47 = vpop.f32.mrf.mxu0 }
 0x1f2   : > { %5554 = vmatprep.mubr.msk.f32.mxu0 %vm546_vm4, %v456_v47  ;;  %v261_v47 = vld [vmem:[%s245_s23 + $0x10] sm:$0xff] }
 0x1f3   : > { %5555 = vmatmul.mubr.msk.f32.vlgmr.msra.gmra.mxu0 %vm546_vm4, %v5544_v45 }
 0x1f4   : > { %5557 = vmatprep.mubr.msk.f32.mxu0 %vm546_vm4, %v537_v48  ;;  %5575 = vmatpush3.msra.mxu0 %v267_v49  ;;  %v259_v48 = vld [vmem:[%s245_s23] sm:$0xff]  ;;  %v262_v49 = vld [vmem:[%s245_s23 + $0x18] sm:$0xff] }
 0x1f5   : > { %5576 = vmatprep.subr.mxu0 %v266_v50 }
 0x1f6   : > { %5577 = vmatpush3.msra.mxu0 %v266_v50 }
 0x1f7   : > { %5558 = vmatmul.mubr.msk.f32.gmra.mxu0 %vm546_vm4, %v5551_v46  ;;  %5578 = vmatprep.subr.mxu0 %v265_v61  ;;  %v260_v46 = vld [vmem:[%s245_s23 + $0x8] sm:$0xff] }
 0x1f8   : > { %5579 = vmatpush3.msra.mxu0 %v265_v61 }
 0x1f9   : > { %5580 = vmatprep.subr.mxu0 %v264_v63 }
 0x1fa   : > { %5581 = vmatpush3.msra.mxu0 %v264_v63 }
 0x1fb   : > { %5602 = vmatprep.subr.mxu0 %v6000_v4 }
 0x2b3   : > { %v5556_v51 = vpop.f32.mrf.mxu0 }
 0x2b4   : > { %v649_v52 = vmax.f32 %v5556_v51, 0.0 }
 0x2b5   : > { %v629_v53 = vpop.f32.mrf.mxu0 }
 0x2b6   : > { %v648_v54 = vmax.f32 %v629_v53, 0.0  ;;  %5560 = vmatprep.subr.mxu1 %v649_v52 }
 0x2b7   : > { %v5559_v55 = vpop.f32.mrf.mxu0  ;;  %5561 = vmatpush3.msra.mxu1 %v649_v52 }
 0x2b8   : > { %v651_v56 = vmax.f32 %v5559_v55, 0.0  ;;  %5562 = vmatprep.subr.mxu1 %v648_v54 }
 0x2b9   : > { %v639_v57 = vpop.f32.mrf.mxu0  ;;  %5563 = vmatpush3.msra.mxu1 %v648_v54 }
 0x2ba   : > { %v650_v58 = vmax.f32 %v639_v57, 0.0  ;;  %5565 = vmatmul.mubr.msk.f32.vlgmr.msra.gmra.mxu1 %vm287_vm2, %v381_v42  ;;  %5567 = vmatprep.subr.mxu1 %v651_v56 }
 0x2bb   : > { %5568 = vmatpush3.msra.mxu1 %v651_v56  ;;  %5571 = vmatprep.mubr.msk.f32.mxu1 %vm287_vm2, %v382_v41 }
 0x2bc   : > { %5569 = vmatprep.subr.mxu1 %v650_v58 }
 0x2bd   : > { %5570 = vmatpush3.msra.mxu1 %v650_v58 }
 0x2be   : > { %5572 = vmatmul.mubr.msk.f32.vlgmr.msra.gmra.mxu1 %vm287_vm2, %v383_v40  ;;  %5588 = vmatprep.subr.mxu1 %v271_v59 }
 0x2bf   : > { %5589 = vmatpush3.msra.mxu1 %v271_v59 }
 0x2c0   : > { %5590 = vmatprep.subr.mxu1 %v270_v60 }
 0x2c1   : > { %5591 = vmatpush3.msra.mxu1 %v270_v60 }
 0x2c2   : > { %5592 = vmatprep.subr.mxu1 %v269_v62 }
 0x2c3   : > { %5593 = vmatpush3.msra.mxu1 %v269_v62 }
 0x2c4   : > { %5594 = vmatprep.subr.mxu1 %v268_v0 }
 0x2c5   : > { %5595 = vmatpush3.msra.mxu1 %v268_v0 }
 0x37a   : > { %v5566_v3 = vpop.f32.mrf.mxu1 }
 0x37c   : > { %v718_v9 = vpop.f32.mrf.mxu1 }
 0x37d   : > { %5582 = vmatprep.mubr.msk.f32.mxu0 %vm802_vm5, %v718_v9  ;;  %5596 = vmatprep.mubr.msk.f32.mxu1 %vm802_vm5, %v718_v9 }
 0x37e   : > { %v5573_v10 = vpop.f32.mrf.mxu1  ;;  %5583 = vmatmul.mubr.msk.f32.vlgmr.msra.gmra.mxu0 %vm802_vm5, %v5566_v3  ;;  %5597 = vmatmul.mubr.msk.f32.vlgmr.msra.gmra.mxu1 %vm802_vm5, %v5566_v3 }
 0x380   : > { %v793_v11 = vpop.f32.mrf.mxu1 }
 0x381   : > { %5585 = vmatprep.mubr.msk.f32.mxu0 %vm802_vm5, %v793_v11  ;;  %5599 = vmatprep.mubr.msk.f32.mxu1 %vm802_vm5, %v793_v11 }
 0x382   : > { %5586 = vmatmul.mubr.msk.f32.gmra.mxu0 %vm802_vm5, %v5573_v10  ;;  %5600 = vmatmul.mubr.msk.f32.gmra.mxu1 %vm802_vm5, %v5573_v10 }
 0x383   : > { %5620 = vmatprep.mubr.msk.f32.mxu1 %vm287_vm2, %v6062_v7  ;;  %5606 = vmatprep.mubr.msk.f32.mxu0 %vm6002_vm7, %v6000_v4 }
 0x43e   : > { %v5584_v12 = vpop.f32.mrf.mxu0  ;;  %v5598_v52 = vpop.f32.mrf.mxu1 }
 0x43f   : > { %v901_v14 = vmax.f32 %v5584_v12, 0.0  ;;  %v990_v55 = vmax.f32 %v5598_v52, 0.0 }
 0x440   : > { %v881_v15 = vpop.f32.mrf.mxu0  ;;  %v970_v58 = vpop.f32.mrf.mxu1 }
 0x441   : > { %v900_v16 = vmax.f32 %v881_v15, 0.0  ;;  %v997_v17 = vsel %vm993_vm6, %v901_v14, -inf  ;;  %v989_v59 = vmax.f32 %v970_v58, 0.0 }
 0x442   : > { %998 = vmax.xlane.f32.xlu1 %v997_v17  ;;  %v5587_v18 = vpop.f32.mrf.mxu0 }
 0x443   : > { %v903_v19 = vmax.f32 %v5587_v18, 0.0  ;;  %v994_v20 = vsel %vm993_vm6, %v900_v16, -inf }
 0x444   : > { %995 = vmax.xlane.f32.xlu0 %v994_v20  ;;  %v891_v21 = vpop.f32.mrf.mxu0  ;;  %v5601_v20 = vpop.f32.mrf.mxu1 }
 0x445   : > { %v902_v22 = vmax.f32 %v891_v21, 0.0  ;;  %v1003_v23 = vsel %vm993_vm6, %v903_v19, -inf }
 0x446   : > { %1004 = vmax.xlane.f32.xlu1 %v1003_v23  ;;  %v980_v21 = vpop.f32.mrf.mxu1 }
 0x447   : > { %v1000_v7 = vsel %vm993_vm6, %v902_v22, -inf  ;;  %v991_v23 = vmax.f32 %v980_v21, 0.0  ;;  %v1925_v21 = vld [vmem:[%s6822_s3 + $0xa0] sm:$0xff] }
 0x448   : > { %1001 = vmax.xlane.f32.xlu0 %v1000_v7 }
 0x4cb   : > { %v999_v25 = vpop.xlane.xlu1 %998 }
 0x4cc   : > { %v1007_v26 = vsub.f32 %v901_v14, %v999_v25 }
 0x4cd   : > { %v996_v27 = vpop.xlane.xlu0 %995 }
 0x4ce   : > { %v1012_v28 = vmul.f32 1.442695, %v1007_v26  ;;  %v1006_v29 = vsub.f32 %v900_v16, %v996_v27 }
 0x4cf   : > { %v1005_v30 = vpop.xlane.xlu1 %1004 }
 0x4d0   : > { %5928 = vpow2.f32 %v1012_v28  ;;  %v1010_v32 = vmul.f32 1.442695, %v1006_v29  ;;  %v1009_v33 = vsub.f32 %v903_v19, %v1005_v30 }
 0x4d1   : > { %v1002_v34 = vpop.xlane.xlu0 %1001 }
 0x4d2   : > { %5930 = vpow2.f32 %v1010_v32  ;;  %v1016_v35 = vmul.f32 1.442695, %v1009_v33  ;;  %v1008_v36 = vsub.f32 %v902_v22, %v1002_v34  ;;  %v992_v22 = vmax.f32 %v5601_v20, 0.0  ;;  %v1930_v20 = vld [vmem:[%s6822_s3 + $0x128] sm:$0xff] }
 0x4d4   : > { %5932 = vpow2.f32 %v1016_v35  ;;  %v1014_v37 = vmul.f32 1.442695, %v1008_v36 }
 0x4d6   : > { %5934 = vpow2.f32 %v1014_v37 }
 0x4dd   : > { %v5929_v38 = vpop.eup %5928 }
 0x4de   : > { %v1021_v39 = vsel %vm993_vm6, %v5929_v38, 0.0 }
 0x4df   : > { %v5931_v40 = vpop.eup %5930  ;;  %1022 = vadd.xlane.f32.xlu1 %v1021_v39 }
 0x4e0   : > { %v1018_v41 = vsel %vm993_vm6, %v5931_v40, 0.0 }
 0x4e1   : > { %v5933_v42 = vpop.eup %5932  ;;  %1019 = vadd.xlane.f32.xlu0 %v1018_v41 }
 0x4e2   : > { %v1027_v43 = vsel %vm993_vm6, %v5933_v42, 0.0 }
 0x4e3   : > { %v5935_v44 = vpop.eup %5934  ;;  %1028 = vadd.xlane.f32.xlu1 %v1027_v43 }
 0x4e4   : > { %v1024_v45 = vsel %vm993_vm6, %v5935_v44, 0.0 }
 0x4e5   : > { %1025 = vadd.xlane.f32.xlu0 %v1024_v45 }
 0x4f4   : > { %1045 = vperm.xlu1 %5919, %v260_v46  }
 0x4f8   : > { %1050 = vperm.xlu1 %5919, %v261_v47  }
 0x4fb   : > { %1040 = vperm.xlu0 %5918, %v259_v48  }
 0x4fc   : > { %1055 = vperm.xlu1 %5919, %v262_v49  }
 0x568   : > { %v1023_v50 = vpop.xlane.xlu1 %1022 }
 0x569   : > { %5936 = vrcp.f32 %v1023_v50 }
 0x56a   : > { %v1020_v51 = vpop.xlane.xlu0 %1019 }
 0x56b   : > { %5938 = vrcp.f32 %v1020_v51 }
 0x56c   : > { %v1029_v53 = vpop.xlane.xlu1 %1028 }
 0x56d   : > { %5940 = vrcp.f32 %v1029_v53  ;;  %v1923_v53 = vld [vmem:[%s6822_s3 + $0x198] sm:$0xff] }
 0x56e   : > { %v1026_v54 = vpop.xlane.xlu0 %1025 }
 0x56f   : > { %5942 = vrcp.f32 %v1026_v54  ;;  %v1922_v54 = vld [vmem:[%s6822_s3 + $0x118] sm:$0xff] }
 0x570   : > { %v1046_v56 = vpop.permute.xlu1 %1045 }
 0x571   : > { %v1059_v57 = vmul.f32 %v1046_v56, %v990_v55  ;;  %v1921_v55 = vld [vmem:[%s6822_s3 + $0x98] sm:$0xff] }
 0x573   : > { %5603 = vmatpush3.msra.mxu0 %v1059_v57 }
 0x574   : > { %5604 = vmatprep.subr.mxu0 %v6000_v4  ;;  %v1051_v14 = vpop.permute.xlu1 %1050 }
 0x575   : > { %v1060_v24 = vmul.f32 %v1051_v14, %v991_v23  ;;  %v1924_v23 = vld [vmem:[%s6822_s3 + $0x20] sm:$0xff] }
 0x576   : > { %v5937_v60 = vpop.eup %5936  ;;  %v1041_v61 = vpop.permute.xlu0 %1040 }
 0x577   : > { %v1035_v62 = vmul.f32 %v5937_v60, %v5929_v38  ;;  %v1058_v63 = vmul.f32 %v1041_v61, %v989_v59 }
 0x578   : > { %v5939_v0 = vpop.eup %5938  ;;  %v1056_v18 = vpop.permute.xlu1 %1055 }
 0x579   : > { %v6157_v3 = vmul.f32 %v1046_v56, %v1035_v62  ;;  %v1034_v9 = vmul.f32 %v5939_v0, %v5931_v40  ;;  %5605 = vmatpush3.msra.mxu0 %v1058_v63  ;;  %v1061_v7 = vmul.f32 %v1056_v18, %v992_v22  ;;  %v1920_v56 = vld [vmem:[%s6822_s3 + $0x18] sm:$0xff]  ;;  %v1929_v22 = vld [vmem:[%s6822_s3 + $0xa8] sm:$0xff] }
 0x57a   : > { %5609 = vmatprep.subr.mxu0 %v6000_v4  ;;  %v5941_v10 = vpop.eup %5940 }
 0x57b   : > { %v6160_v11 = vmul.f32 %v1041_v61, %v1034_v9  ;;  %5616 = vmatprep.subr.mxu1 %v6157_v3  ;;  %v1037_v17 = vmul.f32 %v5941_v10, %v5933_v42  ;;  %v1927_v9 = vld [vmem:[%s6822_s3 + $0x1a0] sm:$0xff] }
 0x57c   : > { %v5943_v12 = vpop.eup %5942  ;;  %5617 = vmatpush3.msra.mxu1 %v6157_v3  ;;  %v1926_v10 = vld [vmem:[%s6822_s3 + $0x120] sm:$0xff] }
 0x57d   : > { %v1036_v15 = vmul.f32 %v5943_v12, %v5935_v44  ;;  %1066 = vxpose.xlu1.b32.start [1/2] (short) (narrow) %v6160_v11, 8  ;;  %5618 = vmatprep.subr.mxu1 %v6160_v11  ;;  %v6176_v19 = vmul.f32 %v1056_v18, %v1037_v17  ;;  %v1931_v18 = vld [vmem:[%s6822_s3 + $0x1a8] sm:$0xff] }
 0x57e   : > { %5619 = vmatpush3.msra.mxu1 %v6160_v11 }
 0x57f   : > { %v6167_v16 = vmul.f32 %v1051_v14, %v1036_v15  ;;  %5621 = vmatmul.mubr.msk.f32.vlgmr.msra.gmra.mxu1 %vm287_vm2, %v6074_v13  ;;  %5630 = vmatprep.subr.mxu1 %v6000_v4 }
 0x580   : > { %5634 = vmatprep.mubr.msk.f32.mxu1 %vm6002_vm7, %v6000_v4 }
 0x581   : > { %1171 = vxpose.xlu0.b32.start [1/2] (short) (narrow) %v6167_v16, 8  ;;  %1067 = vxpose.xlu1.b32.end [2/2] (short) (narrow) %v6157_v3, 8 }
 0x585   : > { %1172 = vxpose.xlu0.b32.end [2/2] (short) (narrow) %v6176_v19, 8 }
 0x5f9   : > { %v1082_v13 = vpop.trf.xlu1 }
 0x5fa   : > { %5607 = vmatmul.mubr.msk.f32.vlgmr.msra.gmra.mxu0 %vm287_vm2, %v1082_v13 }
 0x5fb   : > { %5610 = vmatpush3.msra.mxu0 %v1061_v7  ;;  %5613 = vmatprep.mubr.msk.f32.mxu0 %vm6002_vm7, %v6000_v4  ;;  %v1928_v7 = vld [vmem:[%s6822_s3 + $0x28] sm:$0xff] }
 0x5fc   : > { %5611 = vmatprep.subr.mxu0 %v6000_v4 }
 0x5fd   : > { %5612 = vmatpush3.msra.mxu0 %v1060_v24  ;;  %v1187_v25 = vpop.trf.xlu0 }
 0x5fe   : > { %5623 = vmatprep.subr.mxu0 %v6176_v19  ;;  %5614 = vmatmul.mubr.msk.f32.vlgmr.msra.gmra.mxu0 %vm287_vm2, %v1187_v25 }
 0x5ff   : > { %5624 = vmatpush3.msra.mxu0 %v6176_v19  ;;  %5627 = vmatprep.mubr.msk.f32.mxu0 %vm287_vm2, %v6059_v6 }
 0x600   : > { %5625 = vmatprep.subr.mxu0 %v6167_v16 }
 0x601   : > { %5626 = vmatpush3.msra.mxu0 %v6167_v16 }
 0x602   : > { %5628 = vmatmul.mubr.msk.f32.vlgmr.msra.gmra.mxu0 %vm287_vm2, %v6065_v8  ;;  %5637 = vmatprep.subr.mxu0 %v6000_v4 }
 0x603   : > { %5641 = vmatprep.mubr.msk.f32.mxu0 %vm6002_vm7, %v6000_v4 }
 0x63f   : > { %v6195_v26 = vpop.f32.mrf.mxu1 }
 0x640   : > { %5631 = vmatpush3.msra.mxu1 %v6195_v26 }
 0x641   : > { %v6198_v27 = vpop.f32.mrf.mxu1  ;;  %5632 = vmatprep.subr.mxu1 %v6000_v4 }
 0x642   : > { %5633 = vmatpush3.msra.mxu1 %v6198_v27 }
 0x643   : > { %5635 = vmatmul.mubr.msk.f32.vlgmr.msra.gmra.mxu1 %vm287_vm2, %v1082_v13  ;;  %5644 = vmatprep.subr.mxu1 %v6000_v4 }
 0x644   : > { %5645 = vmatpush3.msra.mxu1 %v6157_v3  ;;  %5648 = vmatprep.mubr.msk.f32.mxu1 %vm6002_vm7, %v6000_v4 }
 0x645   : > { %5646 = vmatprep.subr.mxu1 %v6000_v4 }
 0x646   : > { %5647 = vmatpush3.msra.mxu1 %v6160_v11 }
 0x647   : > { %5649 = vmatmul.mubr.msk.f32.vlgmr.msra.gmra.mxu1 %vm287_vm2, %v1082_v13  ;;  %5658 = vmatprep.subr.mxu1 %v6000_v4 }
 0x648   : > { %5660 = vmatprep.mubr.msk.f32.mxu1 %vm6002_vm7, %v6000_v4 }
 0x6ba   : > { %v6213_v6 = vpop.f32.mrf.mxu0 }
 0x6bb   : > { %5659 = vmatpush3.msra.mxu1 %v6213_v6 }
 0x6bc   : > { %v5608_v8 = vpop.f32.mrf.mxu0  ;;  %5668 = vmatprep.subr.mxu1 %v1923_v53 }
 0x6be   : > { %v6216_v28 = vpop.f32.mrf.mxu0 }
 0x6c0   : > { %v5615_v29 = vpop.f32.mrf.mxu0 }
 0x6c2   : > { %v6218_v30 = vpop.f32.mrf.mxu0 }
 0x6c3   : > { %5638 = vmatpush3.msra.mxu0 %v6218_v30 }
 0x6c4   : > { %v6221_v32 = vpop.f32.mrf.mxu0  ;;  %5639 = vmatprep.subr.mxu0 %v6000_v4 }
 0x6c5   : > { %5640 = vmatpush3.msra.mxu0 %v6221_v32 }
 0x6c6   : > { %5642 = vmatmul.mubr.msk.f32.vlgmr.msra.gmra.mxu0 %vm287_vm2, %v1187_v25  ;;  %5651 = vmatprep.subr.mxu0 %v6000_v4 }
 0x6c7   : > { %5655 = vmatprep.mubr.msk.f32.mxu0 %vm6002_vm7, %v6000_v4  ;;  %5652 = vmatpush3.msra.mxu0 %v6176_v19 }
 0x6c8   : > { %5653 = vmatprep.subr.mxu0 %v6000_v4 }
 0x6c9   : > { %5654 = vmatpush3.msra.mxu0 %v6167_v16 }
 0x6ca   : > { %5656 = vmatmul.mubr.msk.f32.vlgmr.msra.gmra.mxu0 %vm287_vm2, %v1187_v25  ;;  %5663 = vmatprep.subr.mxu0 %v6000_v4 }
 0x6cb   : > { %5664 = vmatpush3.msra.mxu0 %v6216_v28  ;;  %5665 = vmatprep.mubr.msk.f32.mxu0 %vm6002_vm7, %v6000_v4 }
 0x6cc   : > { %5679 = vmatprep.subr.mxu0 %v6000_v4 }
 0x703   : > { %v6238_v33 = vpop.f32.mrf.mxu1 }
 0x704   : > { %v1932_v34 = vadd.f32 %v6049_v5, %v6238_v33 }
 0x705   : > { %v5636_v35 = vpop.f32.mrf.mxu1 }
 0x706   : > { %v1934_v36 = vsel %vm993_vm6, %v1932_v34, 0.0 }
 0x707   : > { %1935 = vadd.xlane.f32.xlu1 %v1934_v36  ;;  %v6243_v37 = vpop.f32.mrf.mxu1 }
 0x709   : > { %v5650_v38 = vpop.f32.mrf.mxu1 }
 0x786   : > { %v6245_v39 = vpop.f32.mrf.mxu0 }
 0x787   : > { %v1933_v40 = vadd.f32 %v6049_v5, %v6245_v39 }
 0x788   : > { %v5643_v41 = vpop.f32.mrf.mxu0 }
 0x789   : > { %v1937_v42 = vsel %vm993_vm6, %v1933_v40, 0.0 }
 0x78a   : > { %1938 = vadd.xlane.f32.xlu0 %v1937_v42  ;;  %v6250_v43 = vpop.f32.mrf.mxu0 }
 0x78c   : > { %v5657_v44 = vpop.f32.mrf.mxu0 }
 0x790   : > { %v1936_v45 = vpop.xlane.xlu1 %1935 }
 0x791   : > { %5944 = vrsqrt.f32 %v1936_v45 }
 0x79e   : > { %v5945_v46 = vpop.eup %5944 }
 0x79f   : > { %1944 = vxpose.xlu1.b32.start.end [1/1] (short) (narrow) %v5945_v46, 8  ;;  %v1942_v49 = vmul.f32 %v5945_v46, %v1932_v34 }
 0x813   : > { %v1939_v47 = vpop.xlane.xlu0 %1938 }
 0x814   : > { %5946 = vrsqrt.f32 %v1939_v47 }
 0x81b   : > { %v1960_v48 = vpop.trf.xlu1 }
 0x81c   : > { %v2011_v50 = vrot.slane %v1960_v48, %v6086_v31 }
 0x81e   : > { %v2016_v51 = vmul.f32 %v2011_v50, %v1942_v49 }
 0x820   : > { %5661 = vmatmul.mubr.msk.f32.vlgmr.msra.gmra.mxu1 %vm993_vm6, %v2016_v51 }
 0x821   : > { %v5947_v52 = vpop.eup %5946  ;;  %5669 = vmatpush3.msra.mxu1 %v1923_v53 }
 0x822   : > { %1976 = vxpose.xlu0.b32.start.end [1/1] (short) (narrow) %v5947_v52, 8  ;;  %5670 = vmatprep.subr.mxu1 %v1922_v54  ;;  %v1943_v58 = vmul.f32 %v5947_v52, %v1933_v40 }
 0x823   : > { %5671 = vmatpush3.msra.mxu1 %v1922_v54 }
 0x824   : > { %5672 = vmatprep.subr.mxu1 %v1921_v55 }
 0x825   : > { %5673 = vmatpush3.msra.mxu1 %v1921_v55 }
 0x826   : > { %5674 = vmatprep.subr.mxu1 %v1920_v56 }
 0x827   : > { %5675 = vmatpush3.msra.mxu1 %v1920_v56 }
 0x828   : > { %5689 = vmatprep.subr.mxu1 %v1927_v9 }
 0x89e   : > { %v1992_v57 = vpop.trf.xlu0 }
 0x89f   : > { %v2015_v59 = vrot.slane %v1992_v57, %v6086_v31 }
 0x8a1   : > { %v2017_v60 = vmul.f32 %v2015_v59, %v1943_v58 }
 0x8a3   : > { %5666 = vmatmul.mubr.msk.f32.vlgmr.msra.gmra.mxu0 %vm993_vm6, %v2017_v60 }
 0x8a4   : > { %5681 = vmatprep.mubr.msk.f32.mxu0 %vm6002_vm7, %v6000_v4 }
 0x8e0   : > { %v2087_v61 = vpop.f32.mrf.mxu1 }
 0x8e1   : > { %5676 = vmatprep.mubr.msk.f32.mxu1 %vm802_vm5, %v2087_v61 }
 0x8e2   : > { %v5662_v62 = vpop.f32.mrf.mxu1 }
 0x963   : > { %v2160_v63 = vpop.f32.mrf.mxu0 }
 0x964   : > { %5677 = vmatmul.mubr.msk.f32.vlgmr.msra.gmra.mxu1 %vm802_vm5, %v2160_v63 }
 0x965   : > { %v5667_v0 = vpop.f32.mrf.mxu0  ;;  %5690 = vmatpush3.msra.mxu1 %v1927_v9  ;;  %v1890_v9 = vsel %vm802_vm5, %v6213_v6, -inf }
 0x966   : > { %5691 = vmatprep.subr.mxu1 %v1926_v10  ;;  %v1904_v0 = vsel %vm802_vm5, %v6213_v6, 0.0 }
 0x967   : > { %5692 = vmatpush3.msra.mxu1 %v1926_v10  ;;  %v1905_v10 = vrot.slane %v1904_v0, 4 }
 0x968   : > { %5693 = vmatprep.subr.mxu1 %v1925_v21 }
 0x969   : > { %5694 = vmatpush3.msra.mxu1 %v1925_v21 }
 0x96a   : > { %5695 = vmatprep.subr.mxu1 %v1924_v23 }
 0x96b   : > { %5696 = vmatpush3.msra.mxu1 %v1924_v23 }
 0x96c   : > { %5711 = vmatprep.subr.mxu1 %v6000_v4 }
 0xa24   : > { %v5678_v12 = vpop.f32.mrf.mxu1 }
 0xa25   : > { %v2246_v17 = vmax.f32 %v5678_v12, 0.0  ;;  %v1911_v12 = vsel %vm802_vm5, %v6216_v28, 0.0 }
 0xa26   : > { %v2236_v14 = vpop.f32.mrf.mxu1 }
 0xa27   : > { %v2245_v15 = vmax.f32 %v2236_v14, 0.0  ;;  %v1891_v14 = vrot.slane %v1890_v9, 4 }
 0xa29   : > { %5680 = vmatpush3.msra.mxu0 %v2245_v15  ;;  %v1897_v15 = vsel %vm802_vm5, %v6216_v28, -inf }
 0xa2a   : > { %5682 = vmatmul.mubr.msk.f32.vlgmr.msra.gmra.mxu0 %vm993_vm6, %v2016_v51  ;;  %5684 = vmatprep.subr.mxu0 %v6000_v4  ;;  %v1898_v21 = vrot.slane %v1897_v15, 4 }
 0xa2b   : > { %5685 = vmatpush3.msra.mxu0 %v2246_v17  ;;  %5686 = vmatprep.mubr.msk.f32.mxu0 %vm6002_vm7, %v6000_v4  ;;  %v1906_v17 = vadd.f32 %v1905_v10, %v1904_v0 }
 0xa2c   : > { %5700 = vmatprep.subr.mxu0 %v1931_v18 }
 0xa2e   : > { %5687 = vmatmul.mubr.msk.f32.vlgmr.msra.gmra.mxu0 %vm993_vm6, %v2017_v60 }
 0xa2f   : > { %5701 = vmatpush3.msra.mxu0 %v1931_v18  ;;  %v1912_v18 = vrot.slane %v1911_v12, 4 }
 0xa30   : > { %5702 = vmatprep.subr.mxu0 %v1930_v20 }
 0xa31   : > { %5703 = vmatpush3.msra.mxu0 %v1930_v20  ;;  %v1892_v20 = vmax.f32 %v1890_v9, %v1891_v14  ;;  %v1913_v23 = vadd.f32 %v1912_v18, %v1911_v12 }
 0xa32   : > { %5704 = vmatprep.subr.mxu0 %v1929_v22 }
 0xa33   : > { %5705 = vmatpush3.msra.mxu0 %v1929_v22  ;;  %v1907_v22 = vrot.slane %v1906_v17, 2  ;;  %v1914_v6 = vrot.slane %v1913_v23, 2 }
 0xa34   : > { %5706 = vmatprep.subr.mxu0 %v1928_v7 }
 0xa35   : > { %5707 = vmatpush3.msra.mxu0 %v1928_v7  ;;  %v1893_v7 = vrot.slane %v1892_v20, 2 }
 0xa36   : > { %5716 = vmatprep.subr.mxu0 %v6000_v4 }
 0xa37   : > { %v1894_v28 = vmax.f32 %v1892_v20, %v1893_v7 }
 0xaea   : > { %v2313_v13 = vpop.f32.mrf.mxu0 }
 0xaeb   : > { %5697 = vmatprep.mubr.msk.f32.mxu1 %vm802_vm5, %v2313_v13  ;;  %5708 = vmatprep.mubr.msk.f32.mxu0 %vm802_vm5, %v2313_v13  ;;  %v1899_v13 = vmax.f32 %v1897_v15, %v1898_v21 }
 0xaec   : > { %v5683_v24 = vpop.f32.mrf.mxu0 }
 0xaee   : > { %v2383_v25 = vpop.f32.mrf.mxu0 }
 0xaef   : > { %5698 = vmatmul.mubr.msk.f32.vlgmr.msra.gmra.mxu1 %vm802_vm5, %v2383_v25  ;;  %5709 = vmatmul.mubr.msk.f32.vlgmr.msra.gmra.mxu0 %vm802_vm5, %v2383_v25  ;;  %v1908_v25 = vadd.f32 %v1907_v22, %v1906_v17 }
 0xaf0   : > { %v5688_v8 = vpop.f32.mrf.mxu0  ;;  %5713 = vmatprep.mubr.msk.f32.mxu1 %vm6002_vm7, %v6000_v4  ;;  %5718 = vmatprep.mubr.msk.f32.mxu0 %vm6002_vm7, %v6000_v4 }
 0xbaf   : > { %v5699_v29 = vpop.f32.mrf.mxu1  ;;  %v5710_v34 = vpop.f32.mrf.mxu0 }
 0xbb0   : > { %v2469_v35 = vmax.f32 %v5699_v29, 0.0  ;;  %v2546_v36 = vmax.f32 %v5710_v34, 0.0 }
 0xbb1   : > { %v2459_v38 = vpop.f32.mrf.mxu1  ;;  %v2536_v40 = vpop.f32.mrf.mxu0 }
 0xbb2   : > { %v2468_v41 = vmax.f32 %v2459_v38, 0.0  ;;  %v2545_v42 = vmax.f32 %v2536_v40, 0.0  ;;  %5717 = vmatpush3.msra.mxu0 %v2546_v36  ;;  %v2550_v44 = vsel %vm546_vm4, %v2469_v35, -inf  ;;  %v1900_v38 = vrot.slane %v1899_v13, 2 }
 0xbb3   : > { %2551 = vmax.xlane.f32.xlu0 %v2550_v44  ;;  %5726 = vmatprep.subr.mxu0 %v6000_v4 }
 0xbb4   : > { %5712 = vmatpush3.msra.mxu1 %v2545_v42  ;;  %v2547_v45 = vsel %vm546_vm4, %v2468_v41, -inf }
 0xbb5   : > { %2548 = vmax.xlane.f32.xlu1 %v2547_v45  ;;  %5721 = vmatprep.subr.mxu1 %v6000_v4  ;;  %v1909_v45 = vrot.slane %v1908_v25, 1 }
 0xbb7   : > { %v1910_v10 = vadd.f32 %v1909_v45, %v1908_v25 }
 0xc3c   : > { %v2552_v46 = vpop.xlane.xlu0 %2551 }
 0xc3d   : > { %v2554_v47 = vsub.f32 %v2469_v35, %v2552_v46  ;;  %v1915_v46 = vadd.f32 %v1914_v6, %v1913_v23  ;;  %v1918_v6 = vmul.f32 0.125, %v1910_v10 }
 0xc3e   : > { %v2549_v48 = vpop.xlane.xlu1 %2548 }
 0xc3f   : > { %v2553_v49 = vsub.f32 %v2468_v41, %v2549_v48  ;;  %v2557_v50 = vmul.f32 1.442695, %v2554_v47  ;;  %v1916_v12 = vrot.slane %v1915_v46, 1 }
 0xc41   : > { %v2555_v51 = vmul.f32 1.442695, %v2553_v49 }
 0xc43   : > { %5948 = vpow2.f32 %v2555_v51 }
 0xc44   : > { %5950 = vpow2.f32 %v2557_v50 }
 0xc50   : > { %v5949_v52 = vpop.eup %5948 }
 0xc51   : > { %v2559_v53 = vsel %vm546_vm4, %v5949_v52, 0.0  ;;  %v5951_v54 = vpop.eup %5950 }
 0xc52   : > { %2560 = vadd.xlane.f32.xlu1 %v2559_v53  ;;  %v2562_v55 = vsel %vm546_vm4, %v5951_v54, 0.0 }
 0xc56   : > { %2563 = vadd.xlane.f32.xlu1 %v2562_v55  ;;  %v1895_v55 = vrot.slane %v1894_v28, 1 }
 0xc58   : > { %v1896_v21 = vmax.f32 %v1894_v28, %v1895_v55 }
 0xcdb   : > { %v2561_v56 = vpop.xlane.xlu1 %2560 }
 0xcdc   : > { %5952 = vrcp.f32 %v2561_v56  ;;  %v1901_v56 = vmax.f32 %v1899_v13, %v1900_v38 }
 0xcde   : > { %v1902_v22 = vrot.slane %v1901_v56, 1 }
 0xcdf   : > { %v2564_v57 = vpop.xlane.xlu1 %2563 }
 0xce0   : > { %5954 = vrcp.f32 %v2564_v57 }
 0xce9   : > { %v5953_v58 = vpop.eup %5952 }
 0xcea   : > { %v6317_v59 = vmul.f32 %v5953_v58, %v5949_v52 }
 0xcec   : > { %2569 = vxpose.xlu1.b32.start.end [1/1] (short) (narrow) %v6317_v59, 8 }
 0xced   : > { %v5955_v60 = vpop.eup %5954 }
 0xcee   : > { %v6320_v61 = vmul.f32 %v5955_v60, %v5951_v54 }
 0xcf0   : > { %2674 = vxpose.xlu0.b32.start.end [1/1] (short) (narrow) %v6320_v61, 8 }
 0xd68   : > { %v6323_v62 = vpop.trf.xlu1 }
 0xd69   : > { %5714 = vmatmul.mubr.msk.f32.vlgmr.msra.gmra.mxu1 %vm993_vm6, %v6323_v62 }
 0xd6a   : > { %5722 = vmatpush3.msra.mxu1 %v6317_v59  ;;  %5723 = vmatprep.mubr.msk.f32.mxu1 %vm6002_vm7, %v6000_v4 }
 0xd6b   : > { %5731 = vmatprep.subr.mxu1 %v6000_v4 }
 0xd6c   : > { %v6331_v63 = vpop.trf.xlu0 }
 0xd6d   : > { %5719 = vmatmul.mubr.msk.f32.vlgmr.msra.gmra.mxu0 %vm993_vm6, %v6331_v63  ;;  %5724 = vmatmul.mubr.msk.f32.vlgmr.msra.gmra.mxu1 %vm993_vm6, %v6238_v33 }
 0xd6e   : > { %5727 = vmatpush3.msra.mxu0 %v6320_v61  ;;  %5728 = vmatprep.mubr.msk.f32.mxu0 %vm6002_vm7, %v6000_v4 }
 0xd6f   : > { %5733 = vmatprep.mubr.msk.f32.mxu1 %vm6002_vm7, %v6000_v4  ;;  %5736 = vmatprep.subr.mxu0 %v6000_v4 }
 0xd71   : > { %5729 = vmatmul.mubr.msk.f32.vlgmr.msra.gmra.mxu0 %vm993_vm6, %v6245_v39 }
 0xd72   : > { %5738 = vmatprep.mubr.msk.f32.mxu0 %vm6002_vm7, %v6000_v4 }
 0xe29   : > { %v2670_v24 = vpop.f32.mrf.mxu1 }
 0xe2a   : > { %v3309_v8 = vsel %vm3308_vm8, %v2670_v24, -inf  ;;  %v3323_v29 = vsel %vm3308_vm8, %v2670_v24, 0.0 }
 0xe2b   : > { %v3310_v34 = vrot.slane %v3309_v8, 4  ;;  %v3324_v35 = vrot.slane %v3323_v29, 4  ;;  %v5715_v36 = vpop.f32.mrf.mxu1 }
 0xe2d   : > { %v3311_v40 = vmax.f32 %v3309_v8, %v3310_v34  ;;  %v3325_v41 = vadd.f32 %v3324_v35, %v3323_v29  ;;  %v2775_v42 = vpop.f32.mrf.mxu0  ;;  %v6357_v44 = vpop.f32.mrf.mxu1  ;;  %v1917_v8 = vadd.f32 %v1916_v12, %v1915_v46 }
 0xe2e   : > { %v3316_v47 = vsel %vm3308_vm8, %v2775_v42, -inf  ;;  %v3330_v48 = vsel %vm3308_vm8, %v2775_v42, 0.0  ;;  %5732 = vmatpush3.msra.mxu1 %v6357_v44  ;;  %vm5183_vm8 = vcmask 89088  }
 0xe2f   : > { %v3312_v49 = vrot.slane %v3311_v40, 2  ;;  %v3326_v50 = vrot.slane %v3325_v41, 2  ;;  %v3317_v51 = vrot.slane %v3316_v47, 4  ;;  %v3331_v52 = vrot.slane %v3330_v48, 4  ;;  %v5720_v53 = vpop.f32.mrf.mxu0  ;;  %v5725_v54 = vpop.f32.mrf.mxu1  ;;  %5734 = vmatmul.mubr.msk.f32.vlgmr.msra.gmra.mxu1 %vm993_vm6, %v6323_v62  ;;  %5741 = vmatprep.subr.mxu1 %v6000_v4 }
 0xe30   : > { %5742 = vmatpush3.msra.mxu1 %v6317_v59  ;;  %5743 = vmatprep.mubr.msk.f32.mxu1 %vm6002_vm7, %v6000_v4 }
 0xe31   : > { %v3313_v57 = vmax.f32 %v3311_v40, %v3312_v49  ;;  %v3327_v58 = vadd.f32 %v3326_v50, %v3325_v41  ;;  %v3318_v60 = vmax.f32 %v3316_v47, %v3317_v51  ;;  %v3332_v0 = vadd.f32 %v3331_v52, %v3330_v48  ;;  %v6368_v9 = vpop.f32.mrf.mxu0  ;;  %5751 = vmatprep.subr.mxu1 %v6000_v4 }
 0xe32   : > { %5737 = vmatpush3.msra.mxu0 %v6368_v9  ;;  %v1919_v40 = vmul.f32 0.125, %v1917_v8 }
 0xe33   : > { %v3314_v14 = vrot.slane %v3313_v57, 1  ;;  %v3328_v15 = vrot.slane %v3327_v58, 1  ;;  %v3319_v17 = vrot.slane %v3318_v60, 2  ;;  %v3333_v18 = vrot.slane %v3332_v0, 2  ;;  %v5730_v20 = vpop.f32.mrf.mxu0  ;;  %5739 = vmatmul.mubr.msk.f32.vlgmr.msra.gmra.mxu0 %vm993_vm6, %v6331_v63  ;;  %5744 = vmatmul.mubr.msk.f32.vlgmr.msra.gmra.mxu1 %vm993_vm6, %v6323_v62 }
 0xe34   : > { %5746 = vmatprep.subr.mxu0 %v6000_v4  ;;  %5752 = vmatpush3.msk.msra.mxu1 %vm559_vm3, %v2670_v24  ;;  %v1903_v24 = vmax.f32 %v1901_v56, %v1902_v22 }
 0xe35   : > { %v3315_v23 = vmax.f32 %v3313_v57, %v3314_v14  ;;  %v3329_v7 = vadd.f32 %v3328_v15, %v3327_v58  ;;  %v3320_v13 = vmax.f32 %v3318_v60, %v3319_v17  ;;  %v3334_v25 = vadd.f32 %v3333_v18, %v3332_v0  ;;  %5747 = vmatpush3.msra.mxu0 %v6320_v61 }
 0xe36   : > { %5748 = vmatprep.mubr.msk.f32.mxu0 %vm6002_vm7, %v6000_v4  ;;  %5756 = vmatprep.subr.mxu0 %v6000_v4 }
 0xe37   : > { %v3337_v62 = vmul.f32 0.25, %v3329_v7  ;;  %v6382_v29 = vadd.f32 %v3315_v23, %v1896_v21  ;;  %v3321_v34 = vrot.slane %v3320_v13, 1  ;;  %v3335_v35 = vrot.slane %v3334_v25, 1  ;;  %5749 = vmatmul.mubr.msk.f32.vlgmr.msra.gmra.mxu0 %vm993_vm6, %v6331_v63  ;;  %5753 = vmatprep.mubr.msk.f32.mxu1 %vm6002_vm7, %v6000_v4  ;;  %v3342_v21 = vld [vmem:[%s6822_s3 + $0x1b0] sm:$0xff] }
 0xe38   : > { %5757 = vmatpush3.msk.msra.mxu0 %vm559_vm3, %v2775_v42  ;;  %5758 = vmatprep.mubr.msk.f32.mxu0 %vm6002_vm7, %v6000_v4 }
 0xe39   : > { %v6391_v36 = vadd.f32 %v3337_v62, %v1918_v6  ;;  %v3322_v28 = vmax.f32 %v3320_v13, %v3321_v34  ;;  %v3336_v38 = vadd.f32 %v3335_v35, %v3334_v25  ;;  %5761 = vmatprep.subr.mxu1 %v6000_v4  ;;  %5772 = vmatprep.subr.mxu0 %v6000_v4  ;;  %v3341_v13 = vld [vmem:[%s6822_s3 + $0x130] sm:$0xff] }
 0xe3a   : > { %v3340_v6 = vld [vmem:[%s6822_s3 + $0xb0] sm:$0xff] }
 0xe3b   : > { %v3338_v41 = vmul.f32 0.25, %v3336_v38  ;;  %v6395_v63 = vadd.f32 %v3322_v28, %v1903_v24 }
 0xe3d   : > { %v6397_v45 = vadd.f32 %v3338_v41, %v1919_v40  ;;  %v3346_v40 = vld [vmem:[%s6822_s3 + $0x1b8] sm:$0xff] }
 0xeef   : > { %v6399_v46 = vpop.f32.mrf.mxu1 }
 0xef0   : > { %v3351_v42 = vadd.f32 %v6049_v5, %v6399_v46 }
 0xef1   : > { %v5735_v47 = vpop.f32.mrf.mxu1 }
 0xef2   : > { %v3353_v48 = vsel %vm3255_vm9, %v3351_v42, 0.0 }
 0xef3   : > { %v6404_v49 = vpop.f32.mrf.mxu0  ;;  %3354 = vadd.xlane.f32.xlu0 %v3353_v48  ;;  %v3131_v50 = vpop.f32.mrf.mxu1 }
 0xef4   : > { %v3253_v51 = vmul.f32 %v3131_v50, %v3131_v50  ;;  %v3352_v52 = vadd.f32 %v6049_v5, %v6404_v49  ;;  %v3344_v50 = vld [vmem:[%s6822_s3 + $0xb8] sm:$0xff] }
 0xef5   : > { %v5740_v53 = vpop.f32.mrf.mxu0  ;;  %v5745_v54 = vpop.f32.mrf.mxu1 }
 0xef6   : > { %v3356_v55 = vsel %vm3255_vm9, %v3352_v52, 0.0  ;;  %v6410_v56 = vsel %vm3255_vm9, %v3253_v51, 0.0  ;;  %v3343_v51 = vld [vmem:[%s6822_s3 + $0x38] sm:$0xff]  ;;  %v3349_v54 = vld [vmem:[%s6822_s3 + $0x140] sm:$0xff] }
 0xef7   : > { %3357 = vadd.xlane.f32.xlu1 %v3356_v55  ;;  %v3201_v57 = vpop.f32.mrf.mxu0 }
 0xef8   : > { %v3254_v58 = vmul.f32 %v3201_v57, %v3201_v57  ;;  %v3348_v57 = vld [vmem:[%s6822_s3 + $0xc0] sm:$0xff] }
 0xef9   : > { %v5750_v60 = vpop.f32.mrf.mxu0 }
 0xefa   : > { %v6413_v0 = vsel %vm3255_vm9, %v3254_v58, 0.0  ;;  %v3347_v60 = vld [vmem:[%s6822_s3 + $0x40] sm:$0xff] }
 0xf7c   : > { %v3355_v10 = vpop.xlane.xlu0 %3354 }
 0xf7d   : > { %5956 = vrsqrt.f32 %v3355_v10 }
 0xf80   : > { %v3358_v12 = vpop.xlane.xlu1 %3357 }
 0xf81   : > { %5958 = vrsqrt.f32 %v3358_v12 }
 0xf8a   : > { %v5957_v14 = vpop.eup %5956 }
 0xf8b   : > { %3363 = vxpose.xlu1.b32.start.end [1/1] (short) (narrow) %v5957_v14, 8  ;;  %v3361_v17 = vmul.f32 %v5957_v14, %v3351_v42  ;;  %v3345_v42 = vld [vmem:[%s6822_s3 + $0x138] sm:$0xff] }
 0xf8e   : > { %v5959_v5 = vpop.eup %5958 }
 0xf8f   : > { %3395 = vxpose.xlu0.b32.start.end [1/1] (short) (narrow) %v5959_v5, 8  ;;  %v3362_v23 = vmul.f32 %v5959_v5, %v3352_v52  ;;  %v3350_v52 = vld [vmem:[%s6822_s3 + $0x1c0] sm:$0xff] }
0x1007   : > { %v3379_v15 = vpop.trf.xlu1 }
0x1008   : > { %v3430_v18 = vrot.slane %v3379_v15, %v6086_v31 }
0x100a   : > { %v3435_v20 = vmul.f32 %v3430_v18, %v3361_v17 }
0x100b   : > { %v3411_v22 = vpop.trf.xlu0 }
0x100c   : > { %v3434_v7 = vrot.slane %v3411_v22, %v6086_v31  ;;  %5754 = vmatmul.mubr.msk.f32.vlgmr.msra.gmra.mxu1 %vm546_vm4, %v3435_v20  ;;  %v3339_v31 = vld [vmem:[%s6822_s3 + $0x30] sm:$0xff] }
0x100d   : > { %5762 = vmatpush3.msra.mxu1 %v3342_v21  ;;  %5769 = vmatprep.mubr.msk.f32.mxu1 %vm6002_vm7, %v6000_v4 }
0x100e   : > { %v3436_v25 = vmul.f32 %v3434_v7, %v3362_v23  ;;  %5763 = vmatprep.subr.mxu1 %v6000_v4 }
0x100f   : > { %5764 = vmatpush3.msra.mxu1 %v3341_v13 }
0x1010   : > { %5759 = vmatmul.mubr.msk.f32.vlgmr.msra.gmra.mxu0 %vm546_vm4, %v3436_v25  ;;  %5765 = vmatprep.subr.mxu1 %v6000_v4 }
0x1011   : > { %5766 = vmatpush3.msra.mxu1 %v3340_v6  ;;  %5773 = vmatpush3.msra.mxu0 %v3342_v21 }
0x1012   : > { %5767 = vmatprep.subr.mxu1 %v6000_v4  ;;  %5774 = vmatprep.subr.mxu0 %v6000_v4 }
0x1013   : > { %5775 = vmatpush3.msra.mxu0 %v3341_v13  ;;  %5780 = vmatprep.mubr.msk.f32.mxu0 %vm6002_vm7, %v6000_v4 }
0x1014   : > { %5776 = vmatprep.subr.mxu0 %v6000_v4  ;;  %5768 = vmatpush3.msra.mxu1 %v3339_v31 }
0x1015   : > { %5777 = vmatpush3.msra.mxu0 %v3340_v6  ;;  %5783 = vmatprep.subr.mxu1 %v6000_v4 }
0x1016   : > { %5778 = vmatprep.subr.mxu0 %v6000_v4 }
0x1017   : > { %5779 = vmatpush3.msra.mxu0 %v3339_v31 }
0x1018   : > { %5788 = vmatprep.subr.mxu0 %v6000_v4 }
0x10cc   : > { %v3509_v8 = vpop.f32.mrf.mxu1 }
0x10cd   : > { %5770 = vmatmul.mubr.msk.f32.vlgmr.msra.gmra.mxu1 %vm802_vm5, %v3509_v8 }
0x10ce   : > { %v5755_v62 = vpop.f32.mrf.mxu1  ;;  %5785 = vmatprep.mubr.msk.f32.mxu1 %vm6002_vm7, %v6000_v4 }
0x10d0   : > { %v3585_v34 = vpop.f32.mrf.mxu0 }
0x10d1   : > { %5781 = vmatmul.mubr.msk.f32.vlgmr.msra.gmra.mxu0 %vm802_vm5, %v3585_v34 }
0x10d2   : > { %v5760_v35 = vpop.f32.mrf.mxu0  ;;  %5790 = vmatprep.mubr.msk.f32.mxu0 %vm6002_vm7, %v6000_v4 }
0x118d   : > { %v3658_v24 = vpop.f32.mrf.mxu1 }
0x118e   : > { %v3735_v28 = vmax.f32 %v3658_v24, 0.0 }
0x118f   : > { %v5771_v38 = vpop.f32.mrf.mxu1 }
0x1190   : > { %5784 = vmatpush3.msk.msra.mxu1 %vm559_vm3, %v3735_v28 }
0x1191   : > { %v3731_v41 = vpop.f32.mrf.mxu0  ;;  %5786 = vmatmul.mubr.msk.f32.vlgmr.msra.gmra.mxu1 %vm546_vm4, %v3435_v20  ;;  %5793 = vmatprep.subr.mxu1 %v6000_v4 }
0x1192   : > { %v3736_v47 = vmax.f32 %v3731_v41, 0.0  ;;  %5794 = vmatpush3.msra.mxu1 %v3346_v40  ;;  %5801 = vmatprep.mubr.msk.f32.mxu1 %vm6002_vm7, %v6000_v4 }
0x1193   : > { %v5782_v48 = vpop.f32.mrf.mxu0  ;;  %5795 = vmatprep.subr.mxu1 %v6000_v4 }
0x1194   : > { %5789 = vmatpush3.msk.msra.mxu0 %vm559_vm3, %v3736_v47  ;;  %5796 = vmatpush3.msra.mxu1 %v3345_v42 }
0x1195   : > { %5791 = vmatmul.mubr.msk.f32.vlgmr.msra.gmra.mxu0 %vm546_vm4, %v3436_v25  ;;  %5797 = vmatprep.subr.mxu1 %v6000_v4 }
0x1196   : > { %5804 = vmatprep.subr.mxu0 %v6000_v4  ;;  %5798 = vmatpush3.msra.mxu1 %v3344_v50 }
0x1197   : > { %5805 = vmatpush3.msra.mxu0 %v3346_v40  ;;  %5799 = vmatprep.subr.mxu1 %v6000_v4 }
0x1198   : > { %5806 = vmatprep.subr.mxu0 %v6000_v4  ;;  %5800 = vmatpush3.msra.mxu1 %v3343_v51 }
0x1199   : > { %5807 = vmatpush3.msra.mxu0 %v3345_v42  ;;  %5815 = vmatprep.subr.mxu1 %v6000_v4 }
0x119a   : > { %5808 = vmatprep.subr.mxu0 %v6000_v4  ;;  %5812 = vmatprep.mubr.msk.f32.mxu0 %vm6002_vm7, %v6000_v4 }
0x119b   : > { %5809 = vmatpush3.msra.mxu0 %v3344_v50 }
0x119c   : > { %5810 = vmatprep.subr.mxu0 %v6000_v4 }
0x119d   : > { %5811 = vmatpush3.msra.mxu0 %v3343_v51 }
0x119e   : > { %5826 = vmatprep.subr.mxu0 %v6000_v4 }
0x1251   : > { %v3806_v53 = vpop.f32.mrf.mxu1 }
0x1252   : > { %5802 = vmatmul.mubr.msk.f32.vlgmr.msra.gmra.mxu1 %vm802_vm5, %v3806_v53 }
0x1253   : > { %5816 = vmatpush3.msra.mxu1 %v3350_v52  ;;  %v5787_v55 = vpop.f32.mrf.mxu1  ;;  %5823 = vmatprep.mubr.msk.f32.mxu1 %vm6002_vm7, %v6000_v4 }
0x1254   : > { %5817 = vmatprep.subr.mxu1 %v6000_v4  ;;  %v1767_v55 = vmul.f32 %v6221_v32, %v6167_v16 }
0x1255   : > { %5818 = vmatpush3.msra.mxu1 %v3349_v54  ;;  %v3879_v58 = vpop.f32.mrf.mxu0 }
0x1256   : > { %5819 = vmatprep.subr.mxu1 %v6000_v4  ;;  %5813 = vmatmul.mubr.msk.f32.vlgmr.msra.gmra.mxu0 %vm802_vm5, %v3879_v58 }
0x1257   : > { %5820 = vmatpush3.msra.mxu1 %v3348_v57  ;;  %5827 = vmatpush3.msra.mxu0 %v3350_v52  ;;  %v5792_v10 = vpop.f32.mrf.mxu0 }
0x1258   : > { %5821 = vmatprep.subr.mxu1 %v6000_v4  ;;  %5828 = vmatprep.subr.mxu0 %v6000_v4  ;;  %v5988_v10 = vld [vmem:[%s6055_s21] sm:$0xff] }
0x1259   : > { %5822 = vmatpush3.msra.mxu1 %v3347_v60  ;;  %5829 = vmatpush3.msra.mxu0 %v3349_v54  ;;  %v1766_v54 = vmul.f32 %v6195_v26, %v6157_v3 }
0x125a   : > { %5824 = vmatmul.mubr.msk.f32.vlgmr.msra.gmra.mxu1 %vm802_vm5, %v3806_v53  ;;  %5830 = vmatprep.subr.mxu0 %v6000_v4  ;;  %v1765_v53 = vmul.f32 %v6198_v27, %v6160_v11  ;;  %v1775_v27 = vsel %vm993_vm6, %v1767_v55, 0.0 }
0x125b   : > { %5831 = vmatpush3.msra.mxu0 %v3348_v57  ;;  %5834 = vmatprep.mubr.msk.f32.mxu0 %vm6002_vm7, %v6000_v4 }
0x125c   : > { %5832 = vmatprep.subr.mxu0 %v6000_v4  ;;  %5837 = vmatprep.subr.mxu1 %v6000_v4  ;;  %v1769_v57 = vsel %vm993_vm6, %v1765_v53, 0.0 }
0x125d   : > { %5833 = vmatpush3.msra.mxu0 %v3347_v60  ;;  %5839 = vmatprep.mubr.msk.f32.mxu1 %vm6002_vm7, %v6000_v4  ;;  %v1772_v60 = vsel %vm993_vm6, %v1766_v54, 0.0 }
0x125e   : > { %5835 = vmatmul.mubr.msk.f32.vlgmr.msra.gmra.mxu0 %vm802_vm5, %v3879_v58  ;;  %5842 = vmatprep.subr.mxu0 %v6000_v4  ;;  %v1768_v58 = vmul.f32 %v6218_v30, %v6176_v19  ;;  %v5991_v30 = vld [vmem:[%s6055_s21 + $0x18] sm:$0xff] }
0x125f   : > { %5844 = vmatprep.mubr.msk.f32.mxu0 %vm6002_vm7, %v6000_v4 }
0x1260   : > { %v1778_v26 = vsel %vm993_vm6, %v1768_v58, 0.0 }
0x1312   : > { %v3952_v12 = vpop.f32.mrf.mxu1 }
0x1313   : > { %v4029_v14 = vmax.f32 %v3952_v12, 0.0  ;;  %v1718_v12 = vmul.f32 %v5988_v10, %v5988_v10 }
0x1314   : > { %v5803_v5 = vpop.f32.mrf.mxu1 }
0x1315   : > { %v4174_v15 = vsel %vm4173_vm10, %v4029_v14, -inf  ;;  %v1722_v32 = vsel %vm287_vm2, %v1718_v12, 0.0 }
0x1316   : > { %v4025_v17 = vpop.f32.mrf.mxu0  ;;  %4175 = vmax.xlane.f32.xlu0 %v4174_v15  ;;  %v5990_v15 = vld [vmem:[%s6055_s21 + $0x10] sm:$0xff] }
0x1317   : > { %v4030_v18 = vmax.f32 %v4025_v17, 0.0  ;;  %v1720_v17 = vmul.f32 %v5990_v15, %v5990_v15 }
0x1318   : > { %v5814_v20 = vpop.f32.mrf.mxu0 }
0x1319   : > { %v4177_v21 = vsel %vm4173_vm10, %v4030_v18, -inf  ;;  %v1721_v20 = vmul.f32 %v5991_v30, %v5991_v30 }
0x131a   : > { %v4097_v22 = vpop.f32.mrf.mxu1  ;;  %4178 = vmax.xlane.f32.xlu1 %v4177_v21  ;;  %v1728_v21 = vsel %vm287_vm2, %v1720_v17, 0.0 }
0x131b   : > { %v4171_v23 = vmax.f32 %v4097_v22, 0.0  ;;  %v3228_v22 = vmul.f32 %v6357_v44, %v6317_v59  ;;  %v3205_v44 = vmul.f32 %v6238_v33, %v6238_v33  ;;  %v4848_v33 = vld [vmem:[%s6822_s3 + $0x1c8] sm:$0xff] }
0x131c   : > { %v5825_v7 = vpop.f32.mrf.mxu1 }
0x131d   : > { %5838 = vmatpush3.msk.msra.mxu1 %vm559_vm3, %v4171_v23  ;;  %v1731_v23 = vsel %vm287_vm2, %v1721_v20, 0.0  ;;  %v3229_v7 = vmul.f32 %v6368_v9, %v6320_v61 }
0x131e   : > { %v4167_v13 = vpop.f32.mrf.mxu0  ;;  %5847 = vmatprep.subr.mxu1 %v6000_v4 }
0x131f   : > { %v4172_v25 = vmax.f32 %v4167_v13, 0.0  ;;  %v1810_v13 = vmul.f32 %v6243_v37, %v6243_v37 }
0x1320   : > { %v5836_v6 = vpop.f32.mrf.mxu0 }
0x1321   : > { %5843 = vmatpush3.msk.msra.mxu0 %vm559_vm3, %v4172_v25  ;;  %v3230_v25 = vsel %vm546_vm4, %v3228_v22, 0.0  ;;  %v3233_v6 = vsel %vm546_vm4, %v3229_v7, 0.0 }
0x1322   : > { %5852 = vmatprep.subr.mxu0 %v6000_v4 }
0x139f   : > { %v4176_v31 = vpop.xlane.xlu0 %4175 }
0x13a0   : > { %v4180_v8 = vsub.f32 %v4029_v14, %v4176_v31  ;;  %v5989_v14 = vld [vmem:[%s6055_s21 + $0x8] sm:$0xff]  ;;  %v1812_v31 = vsel %vm993_vm6, %v1810_v13, 0.0 }
0x13a1   : > { %v1719_v5 = vmul.f32 %v5989_v14, %v5989_v14 }
0x13a2   : > { %v4182_v62 = vmul.f32 1.442695, %v4180_v8  ;;  %v3207_v8 = vsel %vm993_vm6, %v3205_v44, 0.0 }
0x13a3   : > { %v4179_v34 = vpop.xlane.xlu1 %4178 }
0x13a4   : > { %5960 = vpow2.f32 %v4182_v62  ;;  %v4181_v35 = vsub.f32 %v4030_v18, %v4179_v34  ;;  %v1725_v18 = vsel %vm287_vm2, %v1719_v5, 0.0  ;;  %v4852_v62 = vld [vmem:[%s6822_s3 + $0x1d0] sm:$0xff]  ;;  %v4847_v34 = vld [vmem:[%s6822_s3 + $0x148] sm:$0xff] }
0x13a6   : > { %v4184_v24 = vmul.f32 1.442695, %v4181_v35  ;;  %v4851_v35 = vld [vmem:[%s6822_s3 + $0x150] sm:$0xff] }
0x13a8   : > { %5962 = vpow2.f32 %v4184_v24  ;;  %v4846_v24 = vld [vmem:[%s6822_s3 + $0xc8] sm:$0xff] }
0x13b1   : > { %v5961_v28 = vpop.eup %5960 }
0x13b2   : > { %v4186_v38 = vsel %vm4173_vm10, %v5961_v28, 0.0 }
0x13b3   : > { %4187 = vadd.xlane.f32.xlu1 %v4186_v38  ;;  %v4845_v38 = vld [vmem:[%s6822_s3 + $0x48] sm:$0xff] }
0x13b5   : > { %v5963_v40 = vpop.eup %5962 }
0x13b6   : > { %v4189_v41 = vsel %vm4173_vm10, %v5963_v40, 0.0 }
0x13b7   : > { %4190 = vadd.xlane.f32.xlu1 %v4189_v41  ;;  %v1835_v41 = vadd.f32 1e-14, %v6160_v11 }
0x143c   : > { %v4188_v42 = vpop.xlane.xlu1 %4187 }
0x143d   : > { %5964 = vrcp.f32 %v4188_v42  ;;  %v1837_v42 = vadd.f32 1e-14, %v6167_v16 }
0x1440   : > { %v4191_v47 = vpop.xlane.xlu1 %4190 }
0x1441   : > { %5966 = vrcp.f32 %v4191_v47 }
0x1442   : > { %5968 = vlog2.f32 %v1835_v41 }
0x1443   : > { %5970 = vlog2.f32 %v1837_v42 }
0x144a   : > { %v5965_v48 = vpop.eup %5964 }
0x144b   : > { %v6519_v50 = vmul.f32 %v5965_v48, %v5961_v28  ;;  %v4850_v28 = vld [vmem:[%s6822_s3 + $0xd0] sm:$0xff] }
0x144d   : > { %4196 = vxpose.xlu0.b32.start.end [1/1] (short) (narrow) %v6519_v50, 8 }
0x144e   : > { %v5967_v51 = vpop.eup %5966 }
0x144f   : > { %v6522_v52 = vmul.f32 %v5967_v51, %v5963_v40  ;;  %v4849_v40 = vld [vmem:[%s6822_s3 + $0x50] sm:$0xff]  ;;  %v5969_v47 = vpop.eup %5968 }
0x1450   : > { %v1840_v54 = vmul.f32 0.6931472, %v5969_v47  ;;  %v5971_v10 = vpop.eup %5970 }
0x1451   : > { %4304 = vxpose.xlu1.b32.start.end [1/1] (short) (narrow) %v6522_v52, 8  ;;  %v1844_v13 = vmul.f32 0.6931472, %v5971_v10 }
0x1452   : > { %v1847_v17 = vmul.f32 %v1840_v54, %v6160_v11 }
0x1478   : > { %1770 = vadd.xlane.f32.xlu1 %v1769_v57 }
0x147a   : > { %1773 = vadd.xlane.f32.xlu0 %v1772_v60  ;;  %v3279_v60 = vadd.f32 1e-14, %v6317_v59 }
0x147c   : > { %1776 = vadd.xlane.f32.xlu1 %v1775_v27  ;;  %5972 = vlog2.f32 %v3279_v60 }
0x147e   : > { %1779 = vadd.xlane.f32.xlu0 %v1778_v26 }
0x1480   : > { %1723 = vadd.xlane.f32.xlu1 %v1722_v32 }
0x1482   : > { %1726 = vadd.xlane.f32.xlu0 %v1725_v18 }
0x1484   : > { %1729 = vadd.xlane.f32.xlu1 %v1728_v21 }
0x1486   : > { %1732 = vadd.xlane.f32.xlu0 %v1731_v23 }
0x1488   : > { %3231 = vadd.xlane.f32.xlu1 %v3230_v25  ;;  %v4777_v25 = vadd.f32 1e-14, %v6519_v50 }
0x148a   : > { %3234 = vadd.xlane.f32.xlu0 %v3233_v6  ;;  %5974 = vlog2.f32 %v4777_v25 }
0x148c   : > { %1813 = vadd.xlane.f32.xlu1 %v1812_v31 }
0x1490   : > { %3208 = vadd.xlane.f32.xlu1 %v3207_v8 }
0x14c9   : > { %v4212_v9 = vpop.trf.xlu0 }
0x14ca   : > { %5840 = vmatmul.mubr.msk.f32.vlgmr.msra.gmra.mxu1 %vm546_vm4, %v4212_v9 }
0x14cb   : > { %5848 = vmatpush3.msk.msra.mxu1 %vm559_vm3, %v6519_v50  ;;  %5849 = vmatprep.mubr.msk.f32.mxu1 %vm6002_vm7, %v6000_v4 }
0x14cc   : > { %5857 = vmatprep.subr.mxu1 %v6000_v4 }
0x14cd   : > { %v4320_v37 = vpop.trf.xlu1 }
0x14ce   : > { %5845 = vmatmul.mubr.msk.f32.vlgmr.msra.gmra.mxu0 %vm546_vm4, %v4320_v37  ;;  %5850 = vmatmul.mubr.msk.f32.vlgmr.msra.gmra.mxu1 %vm546_vm4, %v6399_v46 }
0x14cf   : > { %5853 = vmatpush3.msk.msra.mxu0 %vm559_vm3, %v6522_v52  ;;  %5858 = vmatpush3.msk.msra.mxu1 %vm559_vm3, %v6519_v50 }
0x14d0   : > { %5854 = vmatprep.mubr.msk.f32.mxu0 %vm6002_vm7, %v6000_v4  ;;  %5859 = vmatprep.mubr.msk.f32.mxu1 %vm6002_vm7, %v6000_v4 }
0x14d1   : > { %5862 = vmatprep.subr.mxu0 %v6000_v4  ;;  %5867 = vmatprep.subr.mxu1 %v6000_v4 }
0x14d2   : > { %5855 = vmatmul.mubr.msk.f32.vlgmr.msra.gmra.mxu0 %vm546_vm4, %v6404_v49  ;;  %5860 = vmatmul.mubr.msk.f32.vlgmr.msra.gmra.mxu1 %vm546_vm4, %v4212_v9 }
0x14d3   : > { %5863 = vmatpush3.msk.msra.mxu0 %vm559_vm3, %v6522_v52  ;;  %5864 = vmatprep.mubr.msk.f32.mxu0 %vm6002_vm7, %v6000_v4  ;;  %vm5174_vm3 = vcmask 48128  }
0x14d4   : > { %5878 = vmatprep.subr.mxu0 %v6000_v4  ;;  %5875 = vmatprep.mubr.msk.f32.mxu1 %vm6002_vm7, %v6000_v4 }
0x14d5   : > { %5868 = vmatpush3.msra.mxu1 %v4852_v62 }
0x14d6   : > { %5865 = vmatmul.mubr.msk.f32.vlgmr.msra.gmra.mxu0 %vm546_vm4, %v4320_v37  ;;  %5869 = vmatprep.subr.mxu1 %v6000_v4 }
0x14d7   : > { %5886 = vmatprep.mubr.msk.f32.mxu0 %vm6002_vm7, %v6000_v4  ;;  %5879 = vmatpush3.msra.mxu0 %v4848_v33 }
0x14d8   : > { %5880 = vmatprep.subr.mxu0 %v6000_v4  ;;  %5870 = vmatpush3.msra.mxu1 %v4851_v35 }
0x14d9   : > { %5881 = vmatpush3.msra.mxu0 %v4847_v34  ;;  %5871 = vmatprep.subr.mxu1 %v6000_v4 }
0x14da   : > { %5882 = vmatprep.subr.mxu0 %v6000_v4  ;;  %5872 = vmatpush3.msra.mxu1 %v4850_v28  ;;  %v1851_v28 = vsel %vm993_vm6, %v1847_v17, 0.0 }
0x14db   : > { %5883 = vmatpush3.msra.mxu0 %v4846_v24  ;;  %5873 = vmatprep.subr.mxu1 %v6000_v4 }
0x14dc   : > { %5884 = vmatprep.subr.mxu0 %v6000_v4  ;;  %5874 = vmatpush3.msra.mxu1 %v4849_v40 }
0x14dd   : > { %5885 = vmatpush3.msra.mxu0 %v4845_v38  ;;  %5889 = vmatprep.subr.mxu1 %v6000_v4  ;;  %v1849_v38 = vmul.f32 %v1844_v13, %v6167_v16  ;;  %v5003_v13 = vld [vmem:[%s6822_s3 + $0x68] ss:$0 sm:$0xff] }
0x14de   : > { %5900 = vmatprep.subr.mxu0 %v6000_v4 }
0x158a   : > { %v4300_v48 = vpop.f32.mrf.mxu1 }
0x158b   : > { %v4807_v51 = vsel %vm4806_vm11, %v4300_v48, -inf  ;;  %v4821_v53 = vsel %vm4806_vm11, %v4300_v48, 0.0 }
0x158c   : > { %v4808_v55 = vrot.slane %v4807_v51, 4  ;;  %v4822_v57 = vrot.slane %v4821_v53, 4  ;;  %v5841_v58 = vpop.f32.mrf.mxu1 }
0x158e   : > { %v4809_v12 = vmax.f32 %v4807_v51, %v4808_v55  ;;  %v4823_v27 = vadd.f32 %v4822_v57, %v4821_v53  ;;  %v4408_v14 = vpop.f32.mrf.mxu0  ;;  %v4484_v5 = vpop.f32.mrf.mxu1  ;;  %v1857_v55 = vsel %vm993_vm6, %v1849_v38, 0.0 }
0x158f   : > { %v4814_v26 = vsel %vm4806_vm11, %v4408_v14, -inf  ;;  %v4828_v32 = vsel %vm4806_vm11, %v4408_v14, 0.0  ;;  %v4727_v15 = vmul.f32 %v4484_v5, %v6519_v50  ;;  %v5973_v14 = vpop.eup %5972  ;;  %v6688_v38 = vpop.xlane.xlu0 %1773 }
0x1590   : > { %v4810_v18 = vrot.slane %v4809_v12, 2  ;;  %v4824_v30 = vrot.slane %v4823_v27, 2  ;;  %v4815_v20 = vrot.slane %v4814_v26, 4  ;;  %v4829_v21 = vrot.slane %v4828_v32, 4  ;;  %v5846_v22 = vpop.f32.mrf.mxu0  ;;  %v5851_v23 = vpop.f32.mrf.mxu1 }
0x1591   : > { %v4729_v7 = vsel %vm4173_vm10, %v4727_v15, 0.0  ;;  %v3282_v15 = vmul.f32 0.6931472, %v5973_v14  ;;  %v5006_v22 = vld [vmem:[%s6822_s3 + $0x58] sm:$0xff] }
0x1592   : > { %v4811_v6 = vmax.f32 %v4809_v12, %v4810_v18  ;;  %v4825_v31 = vadd.f32 %v4824_v30, %v4823_v27  ;;  %v4816_v44 = vmax.f32 %v4814_v26, %v4815_v20  ;;  %v4830_v8 = vadd.f32 %v4829_v21, %v4828_v32  ;;  %v6628_v9 = vpop.f32.mrf.mxu0  ;;  %4730 = vadd.xlane.f32.xlu1 %v4729_v7  ;;  %v4630_v11 = vpop.f32.mrf.mxu1  ;;  %v5009_v21 = vld [vmem:[%s6822_s3 + $0x1d8] sm:$0xff] }
0x1593   : > { %v4704_v27 = vmul.f32 %v6399_v46, %v6399_v46 }
0x1594   : > { %v4812_v37 = vrot.slane %v4811_v6, 1  ;;  %v4826_v33 = vrot.slane %v4825_v31, 1  ;;  %v4817_v62 = vrot.slane %v4816_v44, 2  ;;  %v4831_v34 = vrot.slane %v4830_v8, 2  ;;  %v5856_v35 = vpop.f32.mrf.mxu0  ;;  %v5861_v24 = vpop.f32.mrf.mxu1 }
0x1595   : > { %v4706_v46 = vsel %vm3255_vm9, %v4704_v27, 0.0 }
0x1596   : > { %v4827_v40 = vadd.f32 %v4826_v33, %v4825_v31  ;;  %v4818_v41 = vmax.f32 %v4816_v44, %v4817_v62  ;;  %v4832_v42 = vadd.f32 %v4831_v34, %v4830_v8  ;;  %v6632_v47 = vpop.f32.mrf.mxu0  ;;  %1852 = vadd.xlane.f32.xlu1 %v1851_v28  ;;  %v4813_v48 = vmax.f32 %v4811_v6, %v4812_v37  ;;  %v5085_v37 = vld [vmem:[%s6822_s3 + $0x60] sm:$0xff]  ;;  %v5010_v33 = vld [vmem:[%s6822_s3 + $0x70] ss:$0 sm:$0xff]  ;;  %v6686_v28 = vpop.xlane.xlu1 %1770 }
0x1598   : > { %v4819_v51 = vrot.slane %v4818_v41, 1  ;;  %v4833_v53 = vrot.slane %v4832_v42, 1  ;;  %v5866_v54 = vpop.f32.mrf.mxu0  ;;  %v4835_v57 = vmul.f32 0.5, %v4827_v40  ;;  %v4839_v10 = vadd.f32 %v6382_v29, %v4813_v48 }
0x1599   : > { %v6699_v54 = vsub.s32 %v6041_v2, %v6039_v1 }
0x159a   : > { %v4820_v58 = vmax.f32 %v4818_v41, %v4819_v51  ;;  %v4834_v60 = vadd.f32 %v4833_v53, %v4832_v42  ;;  %1858 = vadd.xlane.f32.xlu1 %v1857_v55  ;;  %v4843_v5 = vadd.f32 %v6391_v36, %v4835_v57  ;;  %v5975_v36 = vpop.eup %5974  ;;  %v6690_v40 = vpop.xlane.xlu1 %1776  ;;  %v1742_v51 = vadd.s32 4294967288, %v6041_v2  ;;  %v5087_v55 = vld [vmem:[%s6822_s3 + $0x78] ss:$0 sm:$0xff] }
0x159b   : > { %v4780_v17 = vmul.f32 0.6931472, %v5975_v36  ;;  %v6692_v41 = vpop.xlane.xlu0 %1779  ;;  %v1838_v53 = vadd.f32 1e-14, %v6176_v19  ;;  %v3206_v36 = vmul.f32 %v6245_v39, %v6245_v39 }
0x159c   : > { %v4836_v16 = vmul.f32 0.5, %v4834_v60  ;;  %v4840_v12 = vadd.f32 %v6395_v63, %v4820_v58  ;;  %v4752_v63 = vmul.f32 %v4630_v11, %v4630_v11  ;;  %v5086_v11 = vld [vmem:[%s6822_s3 + $0xe0] sm:$0xff]  ;;  %v6705_v57 = vsub.s32 %v1742_v51, %v6039_v1 }
0x159d   : > { %v4783_v30 = vmul.f32 %v4780_v17, %v6519_v50  ;;  %v5007_v50 = vld [vmem:[%s6822_s3 + $0xd8] sm:$0xff]  ;;  %v1811_v1 = vmul.f32 %v6250_v43, %v6250_v43  ;;  %v3280_v17 = vadd.f32 1e-14, %v6320_v61 }
0x159e   : > { %v4844_v26 = vadd.f32 %v6397_v45, %v4836_v16  ;;  %3257 = vadd.xlane.f32.xlu1 %v6410_v56  ;;  %v4930_v32 = vsel %vm1758_vm12, %v4840_v12, %v4839_v10  ;;  %v4755_v45 = vsel %vm4754_vm13, %v4752_v63, 0.0  ;;  %v3285_v56 = vmul.f32 %v3282_v15, %v6317_v59  ;;  %v5008_v59 = vld [vmem:[%s6822_s3 + $0x158] sm:$0xff]  ;;  %v1724_v42 = vpop.xlane.xlu1 %1723 }
0x159f   : > { %5887 = vmatmul.mubr.msk.f32.vlgmr.msra.gmra.mxu0 %vm802_vm5, %v4930_v32  ;;  %v4785_v20 = vsel %vm4173_vm10, %v4783_v30, 0.0  ;;  %v1727_v48 = vpop.xlane.xlu0 %1726  ;;  %v1741_v60 = vrot.slane %v1724_v42, %v6699_v54  ;;  %v1815_v15 = vsel %vm993_vm6, %v1811_v1, 0.0 }
0x15a0   : > { %v4855_v29 = vsel %vm1758_vm12, %v4844_v26, %v4843_v5  ;;  %5904 = vmatprep.mubr.msk.f32.mxu0 %vm6002_vm7, %v6000_v4  ;;  %v3287_v18 = vsel %vm546_vm4, %v3285_v56, 0.0  ;;  %5901 = vmatpush3.msra.mxu0 %v5086_v11  ;;  %v1746_v12 = vrot.slane %v1727_v48, %v6705_v57  ;;  %v3210_v56 = vsel %vm993_vm6, %v3206_v36, 0.0 }
0x15a1   : > { %5876 = vmatmul.mubr.msk.f32.vlgmr.msra.gmra.mxu1 %vm802_vm5, %v4855_v29  ;;  %5902 = vmatprep.subr.mxu0 %v6000_v4  ;;  %v1788_v11 = vrot.slane %v6686_v28, %v6699_v54 }
0x15a2   : > { %4707 = vadd.xlane.f32.xlu1 %v4706_v46  ;;  %5897 = vmatprep.mubr.msk.f32.mxu1 %vm6002_vm7, %v6000_v4  ;;  %v1730_v58 = vpop.xlane.xlu1 %1729  ;;  %v1748_v32 = vsel %vm1747_vm15, %v1746_v12, %v1741_v60  ;;  %vm5181_vm7 = vcmask 80896  }
0x15a3   : > { %5890 = vmatpush3.msra.mxu1 %v5009_v21  ;;  %5903 = vmatpush3.msra.mxu0 %v5085_v37  ;;  %v1733_v10 = vpop.xlane.xlu0 %1732  ;;  %v1752_v27 = vrot.slane %v1730_v58, %v6699_v54 }
0x15a4   : > { %5891 = vmatprep.subr.mxu1 %v6000_v4  ;;  %v1756_v2 = vrot.slane %v1733_v10, %v6705_v57 }
0x15a5   : > { %5892 = vmatpush3.msra.mxu1 %v5008_v59  ;;  %v4778_v59 = vadd.f32 1e-14, %v6522_v52 }
0x15a6   : > { %4756 = vadd.xlane.f32.xlu1 %v4755_v45  ;;  %5893 = vmatprep.subr.mxu1 %v6000_v4  ;;  %v1757_v29 = vsel %vm1747_vm15, %v1756_v2, %v1752_v27  ;;  %v4728_v45 = vmul.f32 %v6628_v9, %v6522_v52 }
0x15a7   : > { %5894 = vmatpush3.msra.mxu1 %v5007_v50  ;;  %v6720_v63 = vsel %vm1758_vm12, %v1757_v29, %v1748_v32 }
0x15a8   : > { %5895 = vmatprep.subr.mxu1 %v6000_v4  ;;  %v1836_v4 = vadd.f32 1e-14, %v6157_v3 }
0x15a9   : > { %5896 = vmatpush3.msra.mxu1 %v5006_v22  ;;  %v4705_v22 = vmul.f32 %v6404_v49, %v6404_v49  ;;  %v1801_v49 = vrot.slane %v6692_v41, %v6705_v57 }
0x15aa   : > { %3288 = vadd.xlane.f32.xlu1 %v3287_v18  ;;  %5976 = vlog2.f32 %v1836_v4 }
0x15ab   : > { %5978 = vlog2.f32 %v1838_v53 }
0x15ac   : > { %5980 = vlog2.f32 %v3280_v17 }
0x15ad   : > { %5982 = vlog2.f32 %v4778_v59 }
0x15ae   : > { %4786 = vadd.xlane.f32.xlu1 %v4785_v20  ;;  %v4732_v20 = vsel %vm4173_vm10, %v4728_v45, 0.0  ;;  %v1762_v45 = vsel %vm1761_vm0, %v6720_v63, 0.0 }
0x15b7   : > { %v5977_v46 = vpop.eup %5976 }
0x15b8   : > { %v1842_v43 = vmul.f32 0.6931472, %v5977_v46  ;;  %v5979_v18 = vpop.eup %5978 }
0x15b9   : > { %v1846_v21 = vmul.f32 0.6931472, %v5979_v18 }
0x15ba   : > { %v1848_v30 = vmul.f32 %v1842_v43, %v6157_v3  ;;  %v5981_v3 = vpop.eup %5980 }
0x15bb   : > { %v1850_v50 = vmul.f32 %v1846_v21, %v6176_v19 }
0x15bc   : > { %v1854_v39 = vsel %vm993_vm6, %v1848_v30, 0.0 }
0x15bd   : > { %v1860_v9 = vsel %vm993_vm6, %v1850_v50, 0.0 }
0x165f   : > { %v4999_v23 = vpop.f32.mrf.mxu0 }
0x1661   : > { %v4924_v7 = vpop.f32.mrf.mxu1  ;;  %v5888_v25 = vpop.f32.mrf.mxu0 }
0x1662   : > { %v5000_v6 = vadd.f32 %v4999_v23, %v4924_v7  ;;  %v4753_v23 = vmul.f32 %v6632_v47, %v6632_v47  ;;  %v4709_v7 = vsel %vm3255_vm9, %v4705_v22, 0.0  ;;  %v5983_v25 = vpop.eup %5982  ;;  %v1797_v47 = vrot.slane %v6690_v40, %v6699_v54 }
0x1663   : > { %v5877_v31 = vpop.f32.mrf.mxu1  ;;  %vm5185_vm9 = vcmask 91136  }
0x1664   : > { %v5004_v44 = vadd.f32 %v5003_v13, %v5000_v6  ;;  %v3284_v13 = vmul.f32 0.6931472, %v5981_v3  ;;  %v4758_v19 = vsel %vm4754_vm13, %v4753_v23, 0.0  ;;  %v4782_v31 = vmul.f32 0.6931472, %v5983_v25 }
0x1665   : > { %v1802_v37 = vsel %vm1747_vm15, %v1801_v49, %v1797_v47 }
0x1666   : > { %v5005_v8 = vmax.f32 %v5004_v44, 0.0  ;;  %v3286_v6 = vmul.f32 %v3284_v13, %v6320_v61  ;;  %v3235_v61 = vpop.xlane.xlu0 %3234 }
0x1668   : > { %5898 = vmatmul.mubr.msk.f32.vlgmr.msra.gmra.mxu1 %vm802_vm5, %v5005_v8  ;;  %v3290_v44 = vsel %vm546_vm4, %v3286_v6, 0.0  ;;  %v4784_v8 = vmul.f32 %v4782_v31, %v6522_v52  ;;  %vm5176_vm4 = vcmask 56320   ;;  %vm5179_vm5 = vcmask 72704  }
0x1728   : > { %v5080_v62 = vpop.f32.mrf.mxu1 }
0x1729   : > { %v5081_v34 = vadd.f32 %v5080_v62, %v5010_v33  ;;  %v3232_v33 = vpop.xlane.xlu1 %3231  ;;  %v4788_v62 = vsel %vm4173_vm10, %v4784_v8, 0.0 }
0x172a   : > { %v5899_v35 = vpop.f32.mrf.mxu1  ;;  %v3241_v52 = vrot.slane %v3232_v33, %v6699_v54 }
0x172b   : > { %v5084_v24 = vmax.f32 %v5081_v34, 0.0  ;;  %v3245_v35 = vrot.slane %v3235_v61, %v6699_v54 }
0x172d   : > { %5905 = vmatmul.mubr.msk.f32.vlgmr.msra.gmra.mxu0 %vm287_vm2, %v5084_v24  ;;  %v3246_v28 = vsel %vm1758_vm12, %v3245_v35, %v3241_v52  ;;  %v1814_v41 = vpop.xlane.xlu1 %1813  ;;  %vm3274_vm2 = vcmask 25600  }
0x172e   : > { %v3248_v40 = vsel %vm1830_vm1, %v3246_v28, 0.0  ;;  %v1823_v36 = vrot.slane %v1814_v41, %v6699_v54 }
0x1731   : > { %v3209_v4 = vpop.xlane.xlu1 %3208 }
0x1735   : > { %v4731_v42 = vpop.xlane.xlu1 %4730 }
0x1739   : > { %v1853_v53 = vpop.xlane.xlu1 %1852 }
0x173a   : > { %v1870_v50 = vrot.slane %v1853_v53, %v6699_v54 }
0x173d   : > { %v1859_v60 = vpop.xlane.xlu1 %1858 }
0x1741   : > { %v3258_v1 = vpop.xlane.xlu1 %3257 }
0x1742   : > { %v3267_v21 = vrot.slane %v3258_v1, %v6699_v54 }
0x1745   : > { %v4708_v29 = vpop.xlane.xlu1 %4707 }
0x1746   : > { %v4717_v6 = vrot.slane %v4708_v29, %v6699_v54 }
0x17ed   : > { %v5157_v16 = vpop.f32.mrf.mxu0 }
0x17ee   : > { %v6711_v14 = vadd.f32 %v5157_v16, %v5087_v55  ;;  %v3218_v16 = vrot.slane %v3209_v4, %v6699_v54 }
0x17ef   : > { %v5906_v5 = vpop.f32.mrf.mxu0 }
0x17f0   : > { %v5162_v26 = vsel %vm5161_vm14, %v6711_v14, -inf }
0x17f1   : > { %5163 = vmax.xlane.f32.xlu0 %v5162_v26 }
0x17f5   : > { %1816 = vadd.xlane.f32.xlu0 %v1815_v15 }
0x17f9   : > { %3211 = vadd.xlane.f32.xlu0 %v3210_v56  ;;  %v1879_v56 = vrot.slane %v1859_v60, %v6699_v54 }
0x17fd   : > { %4733 = vadd.xlane.f32.xlu0 %v4732_v20 }
0x1801   : > { %1855 = vadd.xlane.f32.xlu0 %v1854_v39  ;;  %v4740_v39 = vrot.slane %v4731_v42, %v6699_v54 }
0x1805   : > { %1861 = vadd.xlane.f32.xlu0 %v1860_v9  ;;  %v4757_v9 = vpop.xlane.xlu1 %4756 }
0x1809   : > { %3260 = vadd.xlane.f32.xlu0 %v6413_v0  ;;  %v1792_v0 = vrot.slane %v6688_v38, %v6705_v57  ;;  %v3289_v49 = vpop.xlane.xlu1 %3288 }
0x180b   : > { %v1793_v34 = vsel %vm1747_vm15, %v1792_v0, %v1788_v11  ;;  %v4766_v11 = vrot.slane %v4757_v9, %v6699_v54 }
0x180c   : > { %v1803_v24 = vsel %vm1758_vm12, %v1802_v37, %v1793_v34 }
0x180d   : > { %4710 = vadd.xlane.f32.xlu0 %v4709_v7  ;;  %v1805_v38 = vsel %vm1761_vm0, %v1803_v24, 0.0  ;;  %v4787_v35 = vpop.xlane.xlu1 %4786 }
0x1811   : > { %4759 = vadd.xlane.f32.xlu0 %v4758_v19 }
0x1815   : > { %3291 = vadd.xlane.f32.xlu0 %v3290_v44 }
0x1819   : > { %4789 = vadd.xlane.f32.xlu0 %v4788_v62  ;;  %v3298_v62 = vrot.slane %v3289_v49, %v6699_v54 }
0x181d   : > { %1806 = vadd.xlane.f32.xlu0 %v1805_v38 }
0x1821   : > { %3249 = vadd.xlane.f32.xlu0 %v3248_v40  ;;  %v4796_v40 = vrot.slane %v4787_v35, %v6699_v54 }
0x187a   : > { %v5164_v48 = vpop.xlane.xlu0 %5163 }
0x187b   : > { %v6763_v51 = vsub.f32 %v6711_v14, %v5164_v48 }
0x187d   : > { %v5166_v55 = vmul.f32 1.442695, %v6763_v51 }
0x187e   : > { %v1817_v58 = vpop.xlane.xlu0 %1816 }
0x187f   : > { %5984 = vpow2.f32 %v5166_v55  ;;  %v1827_v46 = vrot.slane %v1817_v58, %v6699_v54 }
0x1881   : > { %v1828_v20 = vsel %vm1758_vm12, %v1827_v46, %v1823_v36 }
0x1882   : > { %v3212_v10 = vpop.xlane.xlu0 %3211  ;;  %v1831_v22 = vsel %vm1830_vm1, %v1828_v20, 0.0 }
0x1883   : > { %v3222_v12 = vrot.slane %v3212_v10, %v6699_v54 }
0x1885   : > { %v3223_v27 = vsel %vm1758_vm12, %v3222_v12, %v3218_v16 }
0x1886   : > { %v4734_v2 = vpop.xlane.xlu0 %4733  ;;  %v3225_v5 = vsel %vm1830_vm1, %v3223_v27, 0.0 }
0x1887   : > { %3226 = vadd.xlane.f32.xlu0 %v3225_v5  ;;  %v4744_v17 = vrot.slane %v4734_v2, %v6699_v54 }
0x1889   : > { %v4745_v7 = vsel %vm1758_vm12, %v4744_v17, %v4740_v39 }
0x188a   : > { %v1856_v14 = vpop.xlane.xlu0 %1855  ;;  %v4747_v31 = vsel %vm3274_vm2, %v4745_v7, 0.0 }
0x188b   : > { %v1874_v18 = vrot.slane %v1856_v14, %v6705_v57 }
0x188c   : > { %v5985_v26 = vpop.eup %5984 }
0x188d   : > { %v5168_v32 = vsel %vm5161_vm14, %v5985_v26, 0.0  ;;  %v1875_v13 = vsel %vm1747_vm15, %v1874_v18, %v1870_v50 }
0x188e   : > { %5169 = vadd.xlane.f32.xlu1 %v5168_v32  ;;  %v1862_v15 = vpop.xlane.xlu0 %1861 }
0x188f   : > { %v1883_v43 = vrot.slane %v1862_v15, %v6705_v57 }
0x1891   : > { %v1884_v63 = vsel %vm1747_vm15, %v1883_v43, %v1879_v56 }
0x1892   : > { %1763 = vadd.xlane.f32.xlu1 %v1762_v45  ;;  %v3261_v30 = vpop.xlane.xlu0 %3260  ;;  %v1885_v19 = vsel %vm1758_vm12, %v1884_v63, %v1875_v13 }
0x1893   : > { %v3271_v59 = vrot.slane %v3261_v30, %v6699_v54  ;;  %v1887_v47 = vsel %vm1761_vm0, %v1885_v19, 0.0 }
0x1895   : > { %v3272_v3 = vsel %vm1758_vm12, %v3271_v59, %v3267_v21 }
0x1896   : > { %1832 = vadd.xlane.f32.xlu1 %v1831_v22  ;;  %v4711_v57 = vpop.xlane.xlu0 %4710  ;;  %v3275_v23 = vsel %vm3274_vm2, %v3272_v3, 0.0 }
0x1897   : > { %v4721_v25 = vrot.slane %v4711_v57, %v6699_v54  ;;  %3276 = vadd.xlane.f32.xlu0 %v3275_v23 }
0x1899   : > { %v4722_v44 = vsel %vm1758_vm12, %v4721_v25, %v4717_v6 }
0x189a   : > { %4748 = vadd.xlane.f32.xlu1 %v4747_v31  ;;  %v4760_v0 = vpop.xlane.xlu0 %4759  ;;  %v4724_v61 = vsel %vm3274_vm2, %v4722_v44, 0.0 }
0x189b   : > { %v4770_v8 = vrot.slane %v4760_v0, %v6699_v54  ;;  %1888 = vadd.xlane.f32.xlu0 %v1887_v47 }
0x189d   : > { %v4771_v33 = vsel %vm1758_vm12, %v4770_v8, %v4766_v11 }
0x189e   : > { %4725 = vadd.xlane.f32.xlu1 %v4724_v61  ;;  %v3292_v37 = vpop.xlane.xlu0 %3291  ;;  %v4773_v24 = vsel %vm4754_vm13, %v4771_v33, 0.0 }
0x189f   : > { %v3302_v34 = vrot.slane %v3292_v37, %v6699_v54 }
0x18a1   : > { %v3303_v52 = vsel %vm1758_vm12, %v3302_v34, %v3298_v62 }
0x18a2   : > { %4774 = vadd.xlane.f32.xlu1 %v4773_v24  ;;  %v4790_v38 = vpop.xlane.xlu0 %4789  ;;  %v3305_v28 = vsel %vm1830_vm1, %v3303_v52, 0.0 }
0x18a3   : > { %v4800_v41 = vrot.slane %v4790_v38, %v6699_v54  ;;  %3306 = vadd.xlane.f32.xlu0 %v3305_v28 }
0x18a5   : > { %v4801_v4 = vsel %vm1758_vm12, %v4800_v41, %v4796_v40 }
0x18a6   : > { %v4803_v42 = vsel %vm3274_vm2, %v4801_v4, 0.0  ;;  %v1807_v48 = vpop.xlane.xlu0 %1806 }
0x18a7   : > { %4804 = vadd.xlane.f32.xlu1 %v4803_v42  ;;  %v1808_v27 = vmul.f32 2.0, %v1807_v48 }
0x18aa   : > { %v3250_v55 = vpop.xlane.xlu0 %3249 }
0x18ab   : > { %v3251_v54 = vmul.f32 2.0, %v3250_v55 }
0x1910   : > { %v3227_v60 = vpop.xlane.xlu0 %3226 }
0x1911   : > { %v3252_v26 = vsub.f32 %v3227_v60, %v3251_v54 }
0x1917   : > { %v5170_v53 = vpop.xlane.xlu1 %5169 }
0x1918   : > { %5986 = vlog2.f32 %v5170_v53 }
0x191b   : > { %v1764_v58 = vpop.xlane.xlu1 %1763 }
0x191c   : > { %v1809_v1 = vsub.f32 %v1764_v58, %v1808_v27 }
0x191f   : > { %v1833_v10 = vpop.xlane.xlu1 %1832 }
0x1920   : > { %v3277_v16 = vpop.xlane.xlu0 %3276  ;;  %v1834_v29 = vadd.f32 %v1833_v10, %v1809_v1 }
0x1921   : > { %v3278_v36 = vadd.f32 %v3277_v16, %v3252_v26 }
0x1923   : > { %v4749_v12 = vpop.xlane.xlu1 %4748 }
0x1924   : > { %v4750_v46 = vmul.f32 2.0, %v4749_v12  ;;  %v1889_v15 = vpop.xlane.xlu0 %1888 }
0x1925   : > { %v5987_v2 = vpop.eup %5986 }
0x1926   : > { %v5172_v5 = vmul.f32 0.6931472, %v5987_v2 }
0x1927   : > { %v4726_v14 = vpop.xlane.xlu1 %4725 }
0x1928   : > { %v5173_v32 = vsub.f32 %v6763_v51, %v5172_v5  ;;  %v4751_v45 = vsub.f32 %v4726_v14, %v4750_v46 }
0x192a   : > { %v5175_v43 = vsel %vm5174_vm3, %v5173_v32, %v1834_v29 }
0x192b   : > { %v5177_v56 = vsel %vm5176_vm4, %v5175_v43, %v1889_v15  ;;  %v4775_v17 = vpop.xlane.xlu1 %4774 }
0x192c   : > { %v4776_v18 = vadd.f32 %v4775_v17, %v4751_v45  ;;  %v5178_v30 = vsel %vm993_vm6, %v5177_v56, %v3278_v36  ;;  %v3307_v20 = vpop.xlane.xlu0 %3306 }
0x192d   : > { %v5180_v21 = vsel %vm5179_vm5, %v5178_v30, %v3307_v20 }
0x192e   : > { %v5182_v59 = vsel %vm5181_vm7, %v5180_v21, %v4776_v18 }
0x1930   : > { %v4805_v51 = vpop.xlane.xlu1 %4804 }
0x1931   : > { %v5184_v39 = vsel %vm5183_vm8, %v5182_v59, %v4805_v51 }
0x1932   : > { %5186 = vst.msk [vmem:[%s250_s11] sm:$0x3] %vm5185_vm9, %v5184_v39 }
0x1933 PF: > { %s14_s15 = sadd.s32 1, %s5998_s15  }
0x1934   : > { %p11_p5 = scmp.ge.s32.totalorder %s14_s15, 4  }
0x1936   :  { %13 = sbr.rel (!%p11_p5) target bundleno = 1 (0x1), region = 72 }

</bundles_post_ra>
